<compile_context>
chip_gen: v7x
topology: tpu7x:2x2x1
jax: 0.10.0
libtpu: 0.0.40
codegen_flags: <defaults>
</compile_context>

<pallas_src>
import functools

import jax
import jax.numpy as jnp
from jax import lax
from jax.experimental import pallas as pl
from jax.experimental.pallas import tpu as pltpu


# ----------------------------------------------------------------------------
# Kernel: the ENTIRE encoder for one batch element.  Grid = (B,).
# All L layers of weights are resident in VMEM; the activation is carried in
# registers across the statically-unrolled layer loop.
# ----------------------------------------------------------------------------
def fused_encoder_kernel(
    x_ref,     # (1, S, E)   input activations for this batch element
    wq_ref,    # (L, E, E)   linearQ weight, (in, out)  -- resident
    w1_ref,    # (L, E, F)   FFN linear-1 weight, (in, out)  -- resident
    w2_ref,    # (L, F, E)   FFN linear-2 weight, (in, out)  -- resident
    vec_ref,   # (L, 8, 128) rows: bq, b1, b2, gamma1, beta1, gamma2, beta2, pad
    o_ref,     # (1, S, E)   output block, written once
    *,
    num_layers: int,
    num_heads: int,
    head_dim: int,
    embed_dim: int,
    ff_dim: int,
):
  eps = 1e-5
  scale = embed_dim ** (-0.5)
  E, F, Dh, H, L = embed_dim, ff_dim, head_dim, num_heads, num_layers

  # Carried activation lives in vregs, always f32 (exact even if o_ref is bf16).
  x = x_ref[0].astype(jnp.float32)                 # (S, E)
  S = x.shape[0]

  # ---- causal mask: torch.triu(ones, diagonal=1) == 1 -> -inf  (built ONCE)
  rows = lax.broadcasted_iota(jnp.int32, (S, S), 0)
  cols = lax.broadcasted_iota(jnp.int32, (S, S), 1)
  neg_mask = jnp.where(cols > rows, -jnp.inf, 0.0).astype(jnp.float32)

  # ---- statically unrolled layer loop (L is tiny; weight slices are static)
  for l in range(L):
    wq = wq_ref[l]                                 # (E, E)
    w1 = w1_ref[l]                                 # (E, F)
    w2 = w2_ref[l]                                 # (F, E)
    vec = vec_ref[l]                               # (8, 128)
    bq, b1, b2 = vec[0, :E], vec[1, :F], vec[2, :E]
    g1, be1 = vec[3, :E], vec[4, :E]
    g2, be2 = vec[5, :E], vec[6, :E]

    # Q/K/V projection (PyTorch quirk: all three use linearQ => Q == K == V)
    q = jnp.dot(x, wq, preferred_element_type=jnp.float32) + bq   # (S, E)

    # per-head attention; head outputs stay in registers, one concat per layer.
    head_outs = []
    for h in range(H):
      qh = q[:, h * Dh:(h + 1) * Dh]                              # (S, Dh)
      s = lax.dot_general(qh, qh, (((1,), (1,)), ((), ())),
                          preferred_element_type=jnp.float32)     # qh @ qh^T
      s = s * scale + neg_mask
      s = s - jnp.max(s, axis=-1, keepdims=True)
      p = jnp.exp(s)
      p = p * pl.reciprocal(jnp.sum(p, axis=-1, keepdims=True), approx=False)
      head_outs.append(jnp.dot(p, qh, preferred_element_type=jnp.float32))
    attn = jnp.concatenate(head_outs, axis=-1)                    # (S, E)

    # residual + LayerNorm1 (dropout is identity in eval mode)
    x1 = x + attn
    mu = jnp.mean(x1, axis=-1, keepdims=True)
    var = jnp.mean((x1 - mu) ** 2, axis=-1, keepdims=True)
    xn1 = (x1 - mu) * lax.rsqrt(var + eps) * g1 + be1

    # feed-forward: Linear -> SiLU -> (Dropout=id) -> Linear
    h1 = jnp.dot(xn1, w1, preferred_element_type=jnp.float32) + b1
    h1 = h1 * jax.nn.sigmoid(h1)                                  # SiLU
    ff = jnp.dot(h1, w2, preferred_element_type=jnp.float32) + b2

    # residual + LayerNorm2
    x2 = xn1 + ff
    mu2 = jnp.mean(x2, axis=-1, keepdims=True)
    var2 = jnp.mean((x2 - mu2) ** 2, axis=-1, keepdims=True)
    x = (x2 - mu2) * lax.rsqrt(var2 + eps) * g2 + be2             # carried in vregs

  o_ref[0] = x.astype(o_ref.dtype)                 # single write per batch element


# ----------------------------------------------------------------------------
# Wrapper: ONE pallas_call for the whole encoder, grid=(B,).
# ----------------------------------------------------------------------------
def custom_transformer_encoder(x, params, *, num_heads):
  B, S, E = x.shape
  L, _, F = params["w1"].shape
  head_dim = E // num_heads

  kernel = functools.partial(
      fused_encoder_kernel,
      num_layers=L, num_heads=num_heads, head_dim=head_dim,
      embed_dim=E, ff_dim=F)

  grid_spec = pltpu.PrefetchScalarGridSpec(
      num_scalar_prefetch=0,
      grid=(B,),
      in_specs=[
          pl.BlockSpec((1, S, E), lambda b: (b, 0, 0)),     # x for this batch element
          pl.BlockSpec((L, E, E), lambda b: (0, 0, 0)),     # all wq, resident
          pl.BlockSpec((L, E, F), lambda b: (0, 0, 0)),     # all w1, resident
          pl.BlockSpec((L, F, E), lambda b: (0, 0, 0)),     # all w2, resident
          pl.BlockSpec((L, 8, 128), lambda b: (0, 0, 0)),   # bias/LN slab, resident
      ],
      out_specs=pl.BlockSpec((1, S, E), lambda b: (b, 0, 0)),
  )

  return pl.pallas_call(
      kernel,
      out_shape=jax.ShapeDtypeStruct((B, S, E), x.dtype),
      grid_spec=grid_spec,
      compiler_params=pltpu.CompilerParams(
          dimension_semantics=("parallel",)),   # b: each v7x TC gets one element
  )(x, params["wq"], params["w1"], params["w2"], params["vec"])


# ----------------------------------------------------------------------------
# Deterministic parameter init (synthetic; shapes follow the module __init__).
# Linear weights are stored (in, out), i.e. already transposed vs. PyTorch, and
# stacked along a leading L axis.  Small vectors are coalesced into a lane-dense
# (L, 8, 128) slab: rows = bq, b1, b2, gamma1, beta1, gamma2, beta2, pad.
# ----------------------------------------------------------------------------
def init_stacked_params(key, num_layers, embed_dim, ff_hidden_dim):
  LANES = 128
  s = 0.05
  wqs, w1s, w2s, vecs = [], [], [], []
  for k in jax.random.split(key, num_layers):
    ks = jax.random.split(k, 4)
    wq = jax.random.normal(ks[0], (embed_dim, embed_dim), jnp.float32) * s
    bq = jax.random.normal(ks[1], (embed_dim,), jnp.float32) * s
    w1 = jax.random.normal(ks[2], (embed_dim, ff_hidden_dim), jnp.float32) * s
    w2 = jax.random.normal(ks[3], (ff_hidden_dim, embed_dim), jnp.float32) * s
    b1 = jnp.zeros((ff_hidden_dim,), jnp.float32)
    b2 = jnp.zeros((embed_dim,), jnp.float32)
    g1 = jnp.ones((embed_dim,), jnp.float32)
    be1 = jnp.zeros((embed_dim,), jnp.float32)
    g2 = jnp.ones((embed_dim,), jnp.float32)
    be2 = jnp.zeros((embed_dim,), jnp.float32)
    pad = lambda v: jnp.pad(v, (0, LANES - v.shape[0]))
    vec = jnp.stack([pad(bq), pad(b1), pad(b2), pad(g1), pad(be1),
                     pad(g2), pad(be2), jnp.zeros((LANES,), jnp.float32)])  # (8, 128)
    wqs.append(wq); w1s.append(w1); w2s.append(w2); vecs.append(vec)
  return {
      "wq": jnp.stack(wqs),    # (L, E, E)
      "w1": jnp.stack(w1s),    # (L, E, F)
      "w2": jnp.stack(w2s),    # (L, F, E)
      "vec": jnp.stack(vecs),  # (L, 8, 128)
  }


# ----------------------------------------------------------------------------
# Pure-JAX reference (same math, no Pallas) for a sanity check.
# ----------------------------------------------------------------------------
def reference_encoder(x, params, num_heads):
  B, S, E = x.shape
  L, _, F = params["w1"].shape
  Dh = E // num_heads
  scale = E ** (-0.5)
  mask = jnp.triu(jnp.ones((S, S)), k=1)
  for l in range(L):
    wq, w1, w2 = params["wq"][l], params["w1"][l], params["w2"][l]
    vec = params["vec"][l]
    bq, b1, b2 = vec[0, :E], vec[1, :F], vec[2, :E]
    g1, be1, g2, be2 = vec[3, :E], vec[4, :E], vec[5, :E], vec[6, :E]
    q = x @ wq + bq
    q4 = q.reshape(B, S, num_heads, Dh).transpose(0, 2, 1, 3)
    s = jnp.einsum("bhqd,bhkd->bhqk", q4, q4) * scale
    s = jnp.where(mask == 1, -jnp.inf, s)
    p_attn = jax.nn.softmax(s, axis=-1)
    attn = jnp.einsum("bhqk,bhkd->bhqd", p_attn, q4)
    attn = attn.transpose(0, 2, 1, 3).reshape(B, S, E)
    x1 = x + attn
    x1 = (x1 - x1.mean(-1, keepdims=True)) / jnp.sqrt(
        x1.var(-1, keepdims=True) + 1e-5)
    x1 = x1 * g1 + be1
    h = x1 @ w1 + b1
    h = h * jax.nn.sigmoid(h)
    ff = h @ w2 + b2
    x2 = x1 + ff
    x2 = (x2 - x2.mean(-1, keepdims=True)) / jnp.sqrt(
        x2.var(-1, keepdims=True) + 1e-5)
    x = x2 * g2 + be2
  return x


if __name__ == "__main__":
  # Small shapes consistent with the module: batch=2, seq=8, embed=32,
  # heads=4, ff_hidden=64, layers=2.
  num_layers, embed_dim, num_heads, ff_hidden_dim = 2, 32, 4, 64
  B, S = 2, 8

  root = jax.random.PRNGKey(0)
  kx, kp = jax.random.split(root)
  x = jax.random.normal(kx, (B, S, embed_dim), jnp.float32)
  params = init_stacked_params(kp, num_layers, embed_dim, ff_hidden_dim)

  out = custom_transformer_encoder(x, params, num_heads=num_heads)
  out = jax.block_until_ready(out)

  # sanity check against pure-JAX reference
  ref = reference_encoder(x, params, num_heads)
  assert out.shape == (B, S, embed_dim)
  assert jnp.allclose(out, ref, atol=1e-4, rtol=1e-4), "mismatch vs reference"

  print("KERNEL_OK")
</pallas_src>

<mosaic_0001>
module attributes {stable_mosaic.version = 11 : i64} {
  func.func @fused_encoder_kernel(%arg0: i32, %arg1: memref<1x8x32xf32, #tpu.memory_space<vmem>>, %arg2: memref<2x32x32xf32, #tpu.memory_space<vmem>>, %arg3: memref<2x32x64xf32, #tpu.memory_space<vmem>>, %arg4: memref<2x64x32xf32, #tpu.memory_space<vmem>>, %arg5: memref<2x8x128xf32, #tpu.memory_space<vmem>>, %arg6: memref<1x8x32xf32, #tpu.memory_space<vmem>>) attributes {dimension_semantics = [#tpu.dimension_semantics<parallel>], iteration_bounds = array<i64: 2>, scalar_prefetch = 0 : i64, scratch_operands = 0 : i64, tpu.core_type = #tpu.core_type<tc>, window_params = [{transform_indices = @transform_0, window_bounds = array<i64: 1, 8, 32>}, {pipeline_mode = #tpu.pipeline_mode<synchronous>, transform_indices = @transform_1, window_bounds = array<i64: 2, 32, 32>}, {pipeline_mode = #tpu.pipeline_mode<synchronous>, transform_indices = @transform_2, window_bounds = array<i64: 2, 32, 64>}, {pipeline_mode = #tpu.pipeline_mode<synchronous>, transform_indices = @transform_3, window_bounds = array<i64: 2, 64, 32>}, {pipeline_mode = #tpu.pipeline_mode<synchronous>, transform_indices = @transform_4, window_bounds = array<i64: 2, 8, 128>}, {transform_indices = @transform_5, window_bounds = array<i64: 1, 8, 32>}]} {
    %c0 = arith.constant 0 : index
    %c0_0 = arith.constant 0 : index
    %c0_1 = arith.constant 0 : index
    %0 = vector.load %arg1[%c0, %c0_0, %c0_1] : memref<1x8x32xf32, #tpu.memory_space<vmem>>, vector<1x8x32xf32>
    %1 = vector.shape_cast %0 : vector<1x8x32xf32> to vector<8x32xf32>
    %2 = tpu.iota {dimensions = array<i32: 0>} : vector<8x8xi32>
    %3 = tpu.iota {dimensions = array<i32: 1>} : vector<8x8xi32>
    %4 = arith.cmpi sgt, %3, %2 : vector<8x8xi32>
    %cst = arith.constant 0xFF800000 : f32
    %cst_2 = arith.constant 0.000000e+00 : f32
    %5 = vector.broadcast %cst : f32 to vector<8x8xf32>
    %6 = vector.broadcast %cst_2 : f32 to vector<8x8xf32>
    %7 = arith.select %4, %5, %6 : vector<8x8xi1>, vector<8x8xf32>
    %c0_3 = arith.constant 0 : index
    %c0_4 = arith.constant 0 : index
    %c0_5 = arith.constant 0 : index
    %8 = vector.load %arg2[%c0_3, %c0_4, %c0_5] : memref<2x32x32xf32, #tpu.memory_space<vmem>>, vector<1x32x32xf32>
    %9 = vector.shape_cast %8 : vector<1x32x32xf32> to vector<32x32xf32>
    %c0_6 = arith.constant 0 : index
    %c0_7 = arith.constant 0 : index
    %c0_8 = arith.constant 0 : index
    %10 = vector.load %arg3[%c0_6, %c0_7, %c0_8] : memref<2x32x64xf32, #tpu.memory_space<vmem>>, vector<1x32x64xf32>
    %11 = vector.shape_cast %10 : vector<1x32x64xf32> to vector<32x64xf32>
    %c0_9 = arith.constant 0 : index
    %c0_10 = arith.constant 0 : index
    %c0_11 = arith.constant 0 : index
    %12 = vector.load %arg4[%c0_9, %c0_10, %c0_11] : memref<2x64x32xf32, #tpu.memory_space<vmem>>, vector<1x64x32xf32>
    %13 = vector.shape_cast %12 : vector<1x64x32xf32> to vector<64x32xf32>
    %c0_12 = arith.constant 0 : index
    %c0_13 = arith.constant 0 : index
    %c0_14 = arith.constant 0 : index
    %14 = vector.load %arg5[%c0_12, %c0_13, %c0_14] : memref<2x8x128xf32, #tpu.memory_space<vmem>>, vector<1x8x128xf32>
    %15 = vector.shape_cast %14 : vector<1x8x128xf32> to vector<8x128xf32>
    %16 = vector.extract_strided_slice %15 {offsets = [0, 0], sizes = [1, 32], strides = [1, 1]} : vector<8x128xf32> to vector<1x32xf32>
    %17 = vector.shape_cast %16 : vector<1x32xf32> to vector<32xf32>
    %18 = vector.extract_strided_slice %15 {offsets = [1, 0], sizes = [1, 64], strides = [1, 1]} : vector<8x128xf32> to vector<1x64xf32>
    %19 = vector.shape_cast %18 : vector<1x64xf32> to vector<64xf32>
    %20 = vector.extract_strided_slice %15 {offsets = [2, 0], sizes = [1, 32], strides = [1, 1]} : vector<8x128xf32> to vector<1x32xf32>
    %21 = vector.shape_cast %20 : vector<1x32xf32> to vector<32xf32>
    %22 = vector.extract_strided_slice %15 {offsets = [3, 0], sizes = [1, 32], strides = [1, 1]} : vector<8x128xf32> to vector<1x32xf32>
    %23 = vector.shape_cast %22 : vector<1x32xf32> to vector<32xf32>
    %24 = vector.extract_strided_slice %15 {offsets = [4, 0], sizes = [1, 32], strides = [1, 1]} : vector<8x128xf32> to vector<1x32xf32>
    %25 = vector.shape_cast %24 : vector<1x32xf32> to vector<32xf32>
    %26 = vector.extract_strided_slice %15 {offsets = [5, 0], sizes = [1, 32], strides = [1, 1]} : vector<8x128xf32> to vector<1x32xf32>
    %27 = vector.shape_cast %26 : vector<1x32xf32> to vector<32xf32>
    %28 = vector.extract_strided_slice %15 {offsets = [6, 0], sizes = [1, 32], strides = [1, 1]} : vector<8x128xf32> to vector<1x32xf32>
    %29 = vector.shape_cast %28 : vector<1x32xf32> to vector<32xf32>
    %cst_15 = arith.constant dense<0.000000e+00> : vector<8x32xf32>
    %30 = tpu.matmul %1, %9, %cst_15 {dimension_numbers = #tpu.dot_dimension_numbers<[1], [0], [0], [1], [0, 0, 1, 1], [], []>} : vector<8x32xf32>, vector<32x32xf32>, vector<8x32xf32> -> vector<8x32xf32>
    %31 = vector.shape_cast %17 : vector<32xf32> to vector<1x32xf32>
    %32 = vector.broadcast %31 : vector<1x32xf32> to vector<8x32xf32>
    %33 = arith.addf %30, %32 : vector<8x32xf32>
    %34 = vector.extract_strided_slice %33 {offsets = [0, 0], sizes = [8, 8], strides = [1, 1]} : vector<8x32xf32> to vector<8x8xf32>
    %cst_16 = arith.constant dense<0.000000e+00> : vector<8x8xf32>
    %35 = tpu.matmul %34, %34, %cst_16 {dimension_numbers = #tpu.dot_dimension_numbers<[1], [1], [0], [0], [0, 0, 1, 0], [], []>} : vector<8x8xf32>, vector<8x8xf32>, vector<8x8xf32> -> vector<8x8xf32>
    %cst_17 = arith.constant 0.176776692 : f32
    %36 = vector.broadcast %cst_17 : f32 to vector<8x8xf32>
    %37 = arith.mulf %35, %36 : vector<8x8xf32>
    %38 = arith.addf %37, %7 : vector<8x8xf32>
    %cst_18 = arith.constant dense<0xFF800000> : vector<8xf32>
    %39 = vector.multi_reduction <maximumf>, %38, %cst_18 [1] : vector<8x8xf32> to vector<8xf32>
    %40 = vector.shape_cast %39 : vector<8xf32> to vector<8x1xf32>
    %41 = vector.broadcast %40 : vector<8x1xf32> to vector<8x8xf32>
    %42 = arith.subf %38, %41 : vector<8x8xf32>
    %43 = math.exp %42 : vector<8x8xf32>
    %cst_19 = arith.constant dense<0.000000e+00> : vector<8xf32>
    %44 = vector.multi_reduction <add>, %43, %cst_19 [1] : vector<8x8xf32> to vector<8xf32>
    %45 = vector.shape_cast %44 : vector<8xf32> to vector<8x1xf32>
    %46 = tpu.reciprocal %45 : vector<8x1xf32> -> vector<8x1xf32>
    %47 = vector.broadcast %46 : vector<8x1xf32> to vector<8x8xf32>
    %48 = arith.mulf %43, %47 : vector<8x8xf32>
    %cst_20 = arith.constant dense<0.000000e+00> : vector<8x8xf32>
    %49 = tpu.matmul %48, %34, %cst_20 {dimension_numbers = #tpu.dot_dimension_numbers<[1], [0], [0], [1], [0, 0, 1, 1], [], []>} : vector<8x8xf32>, vector<8x8xf32>, vector<8x8xf32> -> vector<8x8xf32>
    %50 = vector.extract_strided_slice %33 {offsets = [0, 8], sizes = [8, 8], strides = [1, 1]} : vector<8x32xf32> to vector<8x8xf32>
    %cst_21 = arith.constant dense<0.000000e+00> : vector<8x8xf32>
    %51 = tpu.matmul %50, %50, %cst_21 {dimension_numbers = #tpu.dot_dimension_numbers<[1], [1], [0], [0], [0, 0, 1, 0], [], []>} : vector<8x8xf32>, vector<8x8xf32>, vector<8x8xf32> -> vector<8x8xf32>
    %cst_22 = arith.constant 0.176776692 : f32
    %52 = vector.broadcast %cst_22 : f32 to vector<8x8xf32>
    %53 = arith.mulf %51, %52 : vector<8x8xf32>
    %54 = arith.addf %53, %7 : vector<8x8xf32>
    %cst_23 = arith.constant dense<0xFF800000> : vector<8xf32>
    %55 = vector.multi_reduction <maximumf>, %54, %cst_23 [1] : vector<8x8xf32> to vector<8xf32>
    %56 = vector.shape_cast %55 : vector<8xf32> to vector<8x1xf32>
    %57 = vector.broadcast %56 : vector<8x1xf32> to vector<8x8xf32>
    %58 = arith.subf %54, %57 : vector<8x8xf32>
    %59 = math.exp %58 : vector<8x8xf32>
    %cst_24 = arith.constant dense<0.000000e+00> : vector<8xf32>
    %60 = vector.multi_reduction <add>, %59, %cst_24 [1] : vector<8x8xf32> to vector<8xf32>
    %61 = vector.shape_cast %60 : vector<8xf32> to vector<8x1xf32>
    %62 = tpu.reciprocal %61 : vector<8x1xf32> -> vector<8x1xf32>
    %63 = vector.broadcast %62 : vector<8x1xf32> to vector<8x8xf32>
    %64 = arith.mulf %59, %63 : vector<8x8xf32>
    %cst_25 = arith.constant dense<0.000000e+00> : vector<8x8xf32>
    %65 = tpu.matmul %64, %50, %cst_25 {dimension_numbers = #tpu.dot_dimension_numbers<[1], [0], [0], [1], [0, 0, 1, 1], [], []>} : vector<8x8xf32>, vector<8x8xf32>, vector<8x8xf32> -> vector<8x8xf32>
    %66 = vector.extract_strided_slice %33 {offsets = [0, 16], sizes = [8, 8], strides = [1, 1]} : vector<8x32xf32> to vector<8x8xf32>
    %cst_26 = arith.constant dense<0.000000e+00> : vector<8x8xf32>
    %67 = tpu.matmul %66, %66, %cst_26 {dimension_numbers = #tpu.dot_dimension_numbers<[1], [1], [0], [0], [0, 0, 1, 0], [], []>} : vector<8x8xf32>, vector<8x8xf32>, vector<8x8xf32> -> vector<8x8xf32>
    %cst_27 = arith.constant 0.176776692 : f32
    %68 = vector.broadcast %cst_27 : f32 to vector<8x8xf32>
    %69 = arith.mulf %67, %68 : vector<8x8xf32>
    %70 = arith.addf %69, %7 : vector<8x8xf32>
    %cst_28 = arith.constant dense<0xFF800000> : vector<8xf32>
    %71 = vector.multi_reduction <maximumf>, %70, %cst_28 [1] : vector<8x8xf32> to vector<8xf32>
    %72 = vector.shape_cast %71 : vector<8xf32> to vector<8x1xf32>
    %73 = vector.broadcast %72 : vector<8x1xf32> to vector<8x8xf32>
    %74 = arith.subf %70, %73 : vector<8x8xf32>
    %75 = math.exp %74 : vector<8x8xf32>
    %cst_29 = arith.constant dense<0.000000e+00> : vector<8xf32>
    %76 = vector.multi_reduction <add>, %75, %cst_29 [1] : vector<8x8xf32> to vector<8xf32>
    %77 = vector.shape_cast %76 : vector<8xf32> to vector<8x1xf32>
    %78 = tpu.reciprocal %77 : vector<8x1xf32> -> vector<8x1xf32>
    %79 = vector.broadcast %78 : vector<8x1xf32> to vector<8x8xf32>
    %80 = arith.mulf %75, %79 : vector<8x8xf32>
    %cst_30 = arith.constant dense<0.000000e+00> : vector<8x8xf32>
    %81 = tpu.matmul %80, %66, %cst_30 {dimension_numbers = #tpu.dot_dimension_numbers<[1], [0], [0], [1], [0, 0, 1, 1], [], []>} : vector<8x8xf32>, vector<8x8xf32>, vector<8x8xf32> -> vector<8x8xf32>
    %82 = vector.extract_strided_slice %33 {offsets = [0, 24], sizes = [8, 8], strides = [1, 1]} : vector<8x32xf32> to vector<8x8xf32>
    %cst_31 = arith.constant dense<0.000000e+00> : vector<8x8xf32>
    %83 = tpu.matmul %82, %82, %cst_31 {dimension_numbers = #tpu.dot_dimension_numbers<[1], [1], [0], [0], [0, 0, 1, 0], [], []>} : vector<8x8xf32>, vector<8x8xf32>, vector<8x8xf32> -> vector<8x8xf32>
    %cst_32 = arith.constant 0.176776692 : f32
    %84 = vector.broadcast %cst_32 : f32 to vector<8x8xf32>
    %85 = arith.mulf %83, %84 : vector<8x8xf32>
    %86 = arith.addf %85, %7 : vector<8x8xf32>
    %cst_33 = arith.constant dense<0xFF800000> : vector<8xf32>
    %87 = vector.multi_reduction <maximumf>, %86, %cst_33 [1] : vector<8x8xf32> to vector<8xf32>
    %88 = vector.shape_cast %87 : vector<8xf32> to vector<8x1xf32>
    %89 = vector.broadcast %88 : vector<8x1xf32> to vector<8x8xf32>
    %90 = arith.subf %86, %89 : vector<8x8xf32>
    %91 = math.exp %90 : vector<8x8xf32>
    %cst_34 = arith.constant dense<0.000000e+00> : vector<8xf32>
    %92 = vector.multi_reduction <add>, %91, %cst_34 [1] : vector<8x8xf32> to vector<8xf32>
    %93 = vector.shape_cast %92 : vector<8xf32> to vector<8x1xf32>
    %94 = tpu.reciprocal %93 : vector<8x1xf32> -> vector<8x1xf32>
    %95 = vector.broadcast %94 : vector<8x1xf32> to vector<8x8xf32>
    %96 = arith.mulf %91, %95 : vector<8x8xf32>
    %cst_35 = arith.constant dense<0.000000e+00> : vector<8x8xf32>
    %97 = tpu.matmul %96, %82, %cst_35 {dimension_numbers = #tpu.dot_dimension_numbers<[1], [0], [0], [1], [0, 0, 1, 1], [], []>} : vector<8x8xf32>, vector<8x8xf32>, vector<8x8xf32> -> vector<8x8xf32>
    %98 = tpu.concatenate %49, %65, %81, %97 in 1 : vector<8x8xf32>, vector<8x8xf32>, vector<8x8xf32>, vector<8x8xf32> -> vector<8x32xf32>
    %99 = arith.addf %1, %98 : vector<8x32xf32>
    %cst_36 = arith.constant dense<0.000000e+00> : vector<8xf32>
    %100 = vector.multi_reduction <add>, %99, %cst_36 [1] : vector<8x32xf32> to vector<8xf32>
    %101 = vector.shape_cast %100 : vector<8xf32> to vector<8x1xf32>
    %cst_37 = arith.constant 3.200000e+01 : f32
    %102 = vector.broadcast %cst_37 : f32 to vector<8x1xf32>
    %103 = arith.divf %101, %102 : vector<8x1xf32>
    %104 = vector.broadcast %103 : vector<8x1xf32> to vector<8x32xf32>
    %105 = arith.subf %99, %104 : vector<8x32xf32>
    %106 = arith.mulf %105, %105 : vector<8x32xf32>
    %cst_38 = arith.constant dense<0.000000e+00> : vector<8xf32>
    %107 = vector.multi_reduction <add>, %106, %cst_38 [1] : vector<8x32xf32> to vector<8xf32>
    %108 = vector.shape_cast %107 : vector<8xf32> to vector<8x1xf32>
    %cst_39 = arith.constant 3.200000e+01 : f32
    %109 = vector.broadcast %cst_39 : f32 to vector<8x1xf32>
    %110 = arith.divf %108, %109 : vector<8x1xf32>
    %111 = vector.broadcast %103 : vector<8x1xf32> to vector<8x32xf32>
    %112 = arith.subf %99, %111 : vector<8x32xf32>
    %cst_40 = arith.constant 9.99999974E-6 : f32
    %113 = vector.broadcast %cst_40 : f32 to vector<8x1xf32>
    %114 = arith.addf %110, %113 : vector<8x1xf32>
    %115 = math.rsqrt %114 : vector<8x1xf32>
    %116 = vector.broadcast %115 : vector<8x1xf32> to vector<8x32xf32>
    %117 = arith.mulf %112, %116 : vector<8x32xf32>
    %118 = vector.shape_cast %23 : vector<32xf32> to vector<1x32xf32>
    %119 = vector.broadcast %118 : vector<1x32xf32> to vector<8x32xf32>
    %120 = arith.mulf %117, %119 : vector<8x32xf32>
    %121 = vector.shape_cast %25 : vector<32xf32> to vector<1x32xf32>
    %122 = vector.broadcast %121 : vector<1x32xf32> to vector<8x32xf32>
    %123 = arith.addf %120, %122 : vector<8x32xf32>
    %cst_41 = arith.constant dense<0.000000e+00> : vector<8x64xf32>
    %124 = tpu.matmul %123, %11, %cst_41 {dimension_numbers = #tpu.dot_dimension_numbers<[1], [0], [0], [1], [0, 0, 1, 1], [], []>} : vector<8x32xf32>, vector<32x64xf32>, vector<8x64xf32> -> vector<8x64xf32>
    %125 = vector.shape_cast %19 : vector<64xf32> to vector<1x64xf32>
    %126 = vector.broadcast %125 : vector<1x64xf32> to vector<8x64xf32>
    %127 = arith.addf %124, %126 : vector<8x64xf32>
    %128 = arith.negf %127 : vector<8x64xf32>
    %129 = math.exp %128 : vector<8x64xf32>
    %cst_42 = arith.constant 1.000000e+00 : f32
    %130 = vector.broadcast %cst_42 : f32 to vector<8x64xf32>
    %131 = arith.addf %130, %129 : vector<8x64xf32>
    %132 = arith.divf %130, %131 : vector<8x64xf32>
    %133 = arith.mulf %127, %132 : vector<8x64xf32>
    %cst_43 = arith.constant dense<0.000000e+00> : vector<8x32xf32>
    %134 = tpu.matmul %133, %13, %cst_43 {dimension_numbers = #tpu.dot_dimension_numbers<[1], [0], [0], [1], [0, 0, 1, 1], [], []>} : vector<8x64xf32>, vector<64x32xf32>, vector<8x32xf32> -> vector<8x32xf32>
    %135 = vector.shape_cast %21 : vector<32xf32> to vector<1x32xf32>
    %136 = vector.broadcast %135 : vector<1x32xf32> to vector<8x32xf32>
    %137 = arith.addf %134, %136 : vector<8x32xf32>
    %138 = arith.addf %123, %137 : vector<8x32xf32>
    %cst_44 = arith.constant dense<0.000000e+00> : vector<8xf32>
    %139 = vector.multi_reduction <add>, %138, %cst_44 [1] : vector<8x32xf32> to vector<8xf32>
    %140 = vector.shape_cast %139 : vector<8xf32> to vector<8x1xf32>
    %cst_45 = arith.constant 3.200000e+01 : f32
    %141 = vector.broadcast %cst_45 : f32 to vector<8x1xf32>
    %142 = arith.divf %140, %141 : vector<8x1xf32>
    %143 = vector.broadcast %142 : vector<8x1xf32> to vector<8x32xf32>
    %144 = arith.subf %138, %143 : vector<8x32xf32>
    %145 = arith.mulf %144, %144 : vector<8x32xf32>
    %cst_46 = arith.constant dense<0.000000e+00> : vector<8xf32>
    %146 = vector.multi_reduction <add>, %145, %cst_46 [1] : vector<8x32xf32> to vector<8xf32>
    %147 = vector.shape_cast %146 : vector<8xf32> to vector<8x1xf32>
    %cst_47 = arith.constant 3.200000e+01 : f32
    %148 = vector.broadcast %cst_47 : f32 to vector<8x1xf32>
    %149 = arith.divf %147, %148 : vector<8x1xf32>
    %150 = vector.broadcast %142 : vector<8x1xf32> to vector<8x32xf32>
    %151 = arith.subf %138, %150 : vector<8x32xf32>
    %cst_48 = arith.constant 9.99999974E-6 : f32
    %152 = vector.broadcast %cst_48 : f32 to vector<8x1xf32>
    %153 = arith.addf %149, %152 : vector<8x1xf32>
    %154 = math.rsqrt %153 : vector<8x1xf32>
    %155 = vector.broadcast %154 : vector<8x1xf32> to vector<8x32xf32>
    %156 = arith.mulf %151, %155 : vector<8x32xf32>
    %157 = vector.shape_cast %27 : vector<32xf32> to vector<1x32xf32>
    %158 = vector.broadcast %157 : vector<1x32xf32> to vector<8x32xf32>
    %159 = arith.mulf %156, %158 : vector<8x32xf32>
    %160 = vector.shape_cast %29 : vector<32xf32> to vector<1x32xf32>
    %161 = vector.broadcast %160 : vector<1x32xf32> to vector<8x32xf32>
    %162 = arith.addf %159, %161 : vector<8x32xf32>
    %c1 = arith.constant 1 : index
    %c0_49 = arith.constant 0 : index
    %c0_50 = arith.constant 0 : index
    %163 = vector.load %arg2[%c1, %c0_49, %c0_50] : memref<2x32x32xf32, #tpu.memory_space<vmem>>, vector<1x32x32xf32>
    %164 = vector.shape_cast %163 : vector<1x32x32xf32> to vector<32x32xf32>
    %c1_51 = arith.constant 1 : index
    %c0_52 = arith.constant 0 : index
    %c0_53 = arith.constant 0 : index
    %165 = vector.load %arg3[%c1_51, %c0_52, %c0_53] : memref<2x32x64xf32, #tpu.memory_space<vmem>>, vector<1x32x64xf32>
    %166 = vector.shape_cast %165 : vector<1x32x64xf32> to vector<32x64xf32>
    %c1_54 = arith.constant 1 : index
    %c0_55 = arith.constant 0 : index
    %c0_56 = arith.constant 0 : index
    %167 = vector.load %arg4[%c1_54, %c0_55, %c0_56] : memref<2x64x32xf32, #tpu.memory_space<vmem>>, vector<1x64x32xf32>
    %168 = vector.shape_cast %167 : vector<1x64x32xf32> to vector<64x32xf32>
    %c1_57 = arith.constant 1 : index
    %c0_58 = arith.constant 0 : index
    %c0_59 = arith.constant 0 : index
    %169 = vector.load %arg5[%c1_57, %c0_58, %c0_59] : memref<2x8x128xf32, #tpu.memory_space<vmem>>, vector<1x8x128xf32>
    %170 = vector.shape_cast %169 : vector<1x8x128xf32> to vector<8x128xf32>
    %171 = vector.extract_strided_slice %170 {offsets = [0, 0], sizes = [1, 32], strides = [1, 1]} : vector<8x128xf32> to vector<1x32xf32>
    %172 = vector.shape_cast %171 : vector<1x32xf32> to vector<32xf32>
    %173 = vector.extract_strided_slice %170 {offsets = [1, 0], sizes = [1, 64], strides = [1, 1]} : vector<8x128xf32> to vector<1x64xf32>
    %174 = vector.shape_cast %173 : vector<1x64xf32> to vector<64xf32>
    %175 = vector.extract_strided_slice %170 {offsets = [2, 0], sizes = [1, 32], strides = [1, 1]} : vector<8x128xf32> to vector<1x32xf32>
    %176 = vector.shape_cast %175 : vector<1x32xf32> to vector<32xf32>
    %177 = vector.extract_strided_slice %170 {offsets = [3, 0], sizes = [1, 32], strides = [1, 1]} : vector<8x128xf32> to vector<1x32xf32>
    %178 = vector.shape_cast %177 : vector<1x32xf32> to vector<32xf32>
    %179 = vector.extract_strided_slice %170 {offsets = [4, 0], sizes = [1, 32], strides = [1, 1]} : vector<8x128xf32> to vector<1x32xf32>
    %180 = vector.shape_cast %179 : vector<1x32xf32> to vector<32xf32>
    %181 = vector.extract_strided_slice %170 {offsets = [5, 0], sizes = [1, 32], strides = [1, 1]} : vector<8x128xf32> to vector<1x32xf32>
    %182 = vector.shape_cast %181 : vector<1x32xf32> to vector<32xf32>
    %183 = vector.extract_strided_slice %170 {offsets = [6, 0], sizes = [1, 32], strides = [1, 1]} : vector<8x128xf32> to vector<1x32xf32>
    %184 = vector.shape_cast %183 : vector<1x32xf32> to vector<32xf32>
    %cst_60 = arith.constant dense<0.000000e+00> : vector<8x32xf32>
    %185 = tpu.matmul %162, %164, %cst_60 {dimension_numbers = #tpu.dot_dimension_numbers<[1], [0], [0], [1], [0, 0, 1, 1], [], []>} : vector<8x32xf32>, vector<32x32xf32>, vector<8x32xf32> -> vector<8x32xf32>
    %186 = vector.shape_cast %172 : vector<32xf32> to vector<1x32xf32>
    %187 = vector.broadcast %186 : vector<1x32xf32> to vector<8x32xf32>
    %188 = arith.addf %185, %187 : vector<8x32xf32>
    %189 = vector.extract_strided_slice %188 {offsets = [0, 0], sizes = [8, 8], strides = [1, 1]} : vector<8x32xf32> to vector<8x8xf32>
    %cst_61 = arith.constant dense<0.000000e+00> : vector<8x8xf32>
    %190 = tpu.matmul %189, %189, %cst_61 {dimension_numbers = #tpu.dot_dimension_numbers<[1], [1], [0], [0], [0, 0, 1, 0], [], []>} : vector<8x8xf32>, vector<8x8xf32>, vector<8x8xf32> -> vector<8x8xf32>
    %cst_62 = arith.constant 0.176776692 : f32
    %191 = vector.broadcast %cst_62 : f32 to vector<8x8xf32>
    %192 = arith.mulf %190, %191 : vector<8x8xf32>
    %193 = arith.addf %192, %7 : vector<8x8xf32>
    %cst_63 = arith.constant dense<0xFF800000> : vector<8xf32>
    %194 = vector.multi_reduction <maximumf>, %193, %cst_63 [1] : vector<8x8xf32> to vector<8xf32>
    %195 = vector.shape_cast %194 : vector<8xf32> to vector<8x1xf32>
    %196 = vector.broadcast %195 : vector<8x1xf32> to vector<8x8xf32>
    %197 = arith.subf %193, %196 : vector<8x8xf32>
    %198 = math.exp %197 : vector<8x8xf32>
    %cst_64 = arith.constant dense<0.000000e+00> : vector<8xf32>
    %199 = vector.multi_reduction <add>, %198, %cst_64 [1] : vector<8x8xf32> to vector<8xf32>
    %200 = vector.shape_cast %199 : vector<8xf32> to vector<8x1xf32>
    %201 = tpu.reciprocal %200 : vector<8x1xf32> -> vector<8x1xf32>
    %202 = vector.broadcast %201 : vector<8x1xf32> to vector<8x8xf32>
    %203 = arith.mulf %198, %202 : vector<8x8xf32>
    %cst_65 = arith.constant dense<0.000000e+00> : vector<8x8xf32>
    %204 = tpu.matmul %203, %189, %cst_65 {dimension_numbers = #tpu.dot_dimension_numbers<[1], [0], [0], [1], [0, 0, 1, 1], [], []>} : vector<8x8xf32>, vector<8x8xf32>, vector<8x8xf32> -> vector<8x8xf32>
    %205 = vector.extract_strided_slice %188 {offsets = [0, 8], sizes = [8, 8], strides = [1, 1]} : vector<8x32xf32> to vector<8x8xf32>
    %cst_66 = arith.constant dense<0.000000e+00> : vector<8x8xf32>
    %206 = tpu.matmul %205, %205, %cst_66 {dimension_numbers = #tpu.dot_dimension_numbers<[1], [1], [0], [0], [0, 0, 1, 0], [], []>} : vector<8x8xf32>, vector<8x8xf32>, vector<8x8xf32> -> vector<8x8xf32>
    %cst_67 = arith.constant 0.176776692 : f32
    %207 = vector.broadcast %cst_67 : f32 to vector<8x8xf32>
    %208 = arith.mulf %206, %207 : vector<8x8xf32>
    %209 = arith.addf %208, %7 : vector<8x8xf32>
    %cst_68 = arith.constant dense<0xFF800000> : vector<8xf32>
    %210 = vector.multi_reduction <maximumf>, %209, %cst_68 [1] : vector<8x8xf32> to vector<8xf32>
    %211 = vector.shape_cast %210 : vector<8xf32> to vector<8x1xf32>
    %212 = vector.broadcast %211 : vector<8x1xf32> to vector<8x8xf32>
    %213 = arith.subf %209, %212 : vector<8x8xf32>
    %214 = math.exp %213 : vector<8x8xf32>
    %cst_69 = arith.constant dense<0.000000e+00> : vector<8xf32>
    %215 = vector.multi_reduction <add>, %214, %cst_69 [1] : vector<8x8xf32> to vector<8xf32>
    %216 = vector.shape_cast %215 : vector<8xf32> to vector<8x1xf32>
    %217 = tpu.reciprocal %216 : vector<8x1xf32> -> vector<8x1xf32>
    %218 = vector.broadcast %217 : vector<8x1xf32> to vector<8x8xf32>
    %219 = arith.mulf %214, %218 : vector<8x8xf32>
    %cst_70 = arith.constant dense<0.000000e+00> : vector<8x8xf32>
    %220 = tpu.matmul %219, %205, %cst_70 {dimension_numbers = #tpu.dot_dimension_numbers<[1], [0], [0], [1], [0, 0, 1, 1], [], []>} : vector<8x8xf32>, vector<8x8xf32>, vector<8x8xf32> -> vector<8x8xf32>
    %221 = vector.extract_strided_slice %188 {offsets = [0, 16], sizes = [8, 8], strides = [1, 1]} : vector<8x32xf32> to vector<8x8xf32>
    %cst_71 = arith.constant dense<0.000000e+00> : vector<8x8xf32>
    %222 = tpu.matmul %221, %221, %cst_71 {dimension_numbers = #tpu.dot_dimension_numbers<[1], [1], [0], [0], [0, 0, 1, 0], [], []>} : vector<8x8xf32>, vector<8x8xf32>, vector<8x8xf32> -> vector<8x8xf32>
    %cst_72 = arith.constant 0.176776692 : f32
    %223 = vector.broadcast %cst_72 : f32 to vector<8x8xf32>
    %224 = arith.mulf %222, %223 : vector<8x8xf32>
    %225 = arith.addf %224, %7 : vector<8x8xf32>
    %cst_73 = arith.constant dense<0xFF800000> : vector<8xf32>
    %226 = vector.multi_reduction <maximumf>, %225, %cst_73 [1] : vector<8x8xf32> to vector<8xf32>
    %227 = vector.shape_cast %226 : vector<8xf32> to vector<8x1xf32>
    %228 = vector.broadcast %227 : vector<8x1xf32> to vector<8x8xf32>
    %229 = arith.subf %225, %228 : vector<8x8xf32>
    %230 = math.exp %229 : vector<8x8xf32>
    %cst_74 = arith.constant dense<0.000000e+00> : vector<8xf32>
    %231 = vector.multi_reduction <add>, %230, %cst_74 [1] : vector<8x8xf32> to vector<8xf32>
    %232 = vector.shape_cast %231 : vector<8xf32> to vector<8x1xf32>
    %233 = tpu.reciprocal %232 : vector<8x1xf32> -> vector<8x1xf32>
    %234 = vector.broadcast %233 : vector<8x1xf32> to vector<8x8xf32>
    %235 = arith.mulf %230, %234 : vector<8x8xf32>
    %cst_75 = arith.constant dense<0.000000e+00> : vector<8x8xf32>
    %236 = tpu.matmul %235, %221, %cst_75 {dimension_numbers = #tpu.dot_dimension_numbers<[1], [0], [0], [1], [0, 0, 1, 1], [], []>} : vector<8x8xf32>, vector<8x8xf32>, vector<8x8xf32> -> vector<8x8xf32>
    %237 = vector.extract_strided_slice %188 {offsets = [0, 24], sizes = [8, 8], strides = [1, 1]} : vector<8x32xf32> to vector<8x8xf32>
    %cst_76 = arith.constant dense<0.000000e+00> : vector<8x8xf32>
    %238 = tpu.matmul %237, %237, %cst_76 {dimension_numbers = #tpu.dot_dimension_numbers<[1], [1], [0], [0], [0, 0, 1, 0], [], []>} : vector<8x8xf32>, vector<8x8xf32>, vector<8x8xf32> -> vector<8x8xf32>
    %cst_77 = arith.constant 0.176776692 : f32
    %239 = vector.broadcast %cst_77 : f32 to vector<8x8xf32>
    %240 = arith.mulf %238, %239 : vector<8x8xf32>
    %241 = arith.addf %240, %7 : vector<8x8xf32>
    %cst_78 = arith.constant dense<0xFF800000> : vector<8xf32>
    %242 = vector.multi_reduction <maximumf>, %241, %cst_78 [1] : vector<8x8xf32> to vector<8xf32>
    %243 = vector.shape_cast %242 : vector<8xf32> to vector<8x1xf32>
    %244 = vector.broadcast %243 : vector<8x1xf32> to vector<8x8xf32>
    %245 = arith.subf %241, %244 : vector<8x8xf32>
    %246 = math.exp %245 : vector<8x8xf32>
    %cst_79 = arith.constant dense<0.000000e+00> : vector<8xf32>
    %247 = vector.multi_reduction <add>, %246, %cst_79 [1] : vector<8x8xf32> to vector<8xf32>
    %248 = vector.shape_cast %247 : vector<8xf32> to vector<8x1xf32>
    %249 = tpu.reciprocal %248 : vector<8x1xf32> -> vector<8x1xf32>
    %250 = vector.broadcast %249 : vector<8x1xf32> to vector<8x8xf32>
    %251 = arith.mulf %246, %250 : vector<8x8xf32>
    %cst_80 = arith.constant dense<0.000000e+00> : vector<8x8xf32>
    %252 = tpu.matmul %251, %237, %cst_80 {dimension_numbers = #tpu.dot_dimension_numbers<[1], [0], [0], [1], [0, 0, 1, 1], [], []>} : vector<8x8xf32>, vector<8x8xf32>, vector<8x8xf32> -> vector<8x8xf32>
    %253 = tpu.concatenate %204, %220, %236, %252 in 1 : vector<8x8xf32>, vector<8x8xf32>, vector<8x8xf32>, vector<8x8xf32> -> vector<8x32xf32>
    %254 = arith.addf %162, %253 : vector<8x32xf32>
    %cst_81 = arith.constant dense<0.000000e+00> : vector<8xf32>
    %255 = vector.multi_reduction <add>, %254, %cst_81 [1] : vector<8x32xf32> to vector<8xf32>
    %256 = vector.shape_cast %255 : vector<8xf32> to vector<8x1xf32>
    %cst_82 = arith.constant 3.200000e+01 : f32
    %257 = vector.broadcast %cst_82 : f32 to vector<8x1xf32>
    %258 = arith.divf %256, %257 : vector<8x1xf32>
    %259 = vector.broadcast %258 : vector<8x1xf32> to vector<8x32xf32>
    %260 = arith.subf %254, %259 : vector<8x32xf32>
    %261 = arith.mulf %260, %260 : vector<8x32xf32>
    %cst_83 = arith.constant dense<0.000000e+00> : vector<8xf32>
    %262 = vector.multi_reduction <add>, %261, %cst_83 [1] : vector<8x32xf32> to vector<8xf32>
    %263 = vector.shape_cast %262 : vector<8xf32> to vector<8x1xf32>
    %cst_84 = arith.constant 3.200000e+01 : f32
    %264 = vector.broadcast %cst_84 : f32 to vector<8x1xf32>
    %265 = arith.divf %263, %264 : vector<8x1xf32>
    %266 = vector.broadcast %258 : vector<8x1xf32> to vector<8x32xf32>
    %267 = arith.subf %254, %266 : vector<8x32xf32>
    %cst_85 = arith.constant 9.99999974E-6 : f32
    %268 = vector.broadcast %cst_85 : f32 to vector<8x1xf32>
    %269 = arith.addf %265, %268 : vector<8x1xf32>
    %270 = math.rsqrt %269 : vector<8x1xf32>
    %271 = vector.broadcast %270 : vector<8x1xf32> to vector<8x32xf32>
    %272 = arith.mulf %267, %271 : vector<8x32xf32>
    %273 = vector.shape_cast %178 : vector<32xf32> to vector<1x32xf32>
    %274 = vector.broadcast %273 : vector<1x32xf32> to vector<8x32xf32>
    %275 = arith.mulf %272, %274 : vector<8x32xf32>
    %276 = vector.shape_cast %180 : vector<32xf32> to vector<1x32xf32>
    %277 = vector.broadcast %276 : vector<1x32xf32> to vector<8x32xf32>
    %278 = arith.addf %275, %277 : vector<8x32xf32>
    %cst_86 = arith.constant dense<0.000000e+00> : vector<8x64xf32>
    %279 = tpu.matmul %278, %166, %cst_86 {dimension_numbers = #tpu.dot_dimension_numbers<[1], [0], [0], [1], [0, 0, 1, 1], [], []>} : vector<8x32xf32>, vector<32x64xf32>, vector<8x64xf32> -> vector<8x64xf32>
    %280 = vector.shape_cast %174 : vector<64xf32> to vector<1x64xf32>
    %281 = vector.broadcast %280 : vector<1x64xf32> to vector<8x64xf32>
    %282 = arith.addf %279, %281 : vector<8x64xf32>
    %283 = arith.negf %282 : vector<8x64xf32>
    %284 = math.exp %283 : vector<8x64xf32>
    %cst_87 = arith.constant 1.000000e+00 : f32
    %285 = vector.broadcast %cst_87 : f32 to vector<8x64xf32>
    %286 = arith.addf %285, %284 : vector<8x64xf32>
    %287 = arith.divf %285, %286 : vector<8x64xf32>
    %288 = arith.mulf %282, %287 : vector<8x64xf32>
    %cst_88 = arith.constant dense<0.000000e+00> : vector<8x32xf32>
    %289 = tpu.matmul %288, %168, %cst_88 {dimension_numbers = #tpu.dot_dimension_numbers<[1], [0], [0], [1], [0, 0, 1, 1], [], []>} : vector<8x64xf32>, vector<64x32xf32>, vector<8x32xf32> -> vector<8x32xf32>
    %290 = vector.shape_cast %176 : vector<32xf32> to vector<1x32xf32>
    %291 = vector.broadcast %290 : vector<1x32xf32> to vector<8x32xf32>
    %292 = arith.addf %289, %291 : vector<8x32xf32>
    %293 = arith.addf %278, %292 : vector<8x32xf32>
    %cst_89 = arith.constant dense<0.000000e+00> : vector<8xf32>
    %294 = vector.multi_reduction <add>, %293, %cst_89 [1] : vector<8x32xf32> to vector<8xf32>
    %295 = vector.shape_cast %294 : vector<8xf32> to vector<8x1xf32>
    %cst_90 = arith.constant 3.200000e+01 : f32
    %296 = vector.broadcast %cst_90 : f32 to vector<8x1xf32>
    %297 = arith.divf %295, %296 : vector<8x1xf32>
    %298 = vector.broadcast %297 : vector<8x1xf32> to vector<8x32xf32>
    %299 = arith.subf %293, %298 : vector<8x32xf32>
    %300 = arith.mulf %299, %299 : vector<8x32xf32>
    %cst_91 = arith.constant dense<0.000000e+00> : vector<8xf32>
    %301 = vector.multi_reduction <add>, %300, %cst_91 [1] : vector<8x32xf32> to vector<8xf32>
    %302 = vector.shape_cast %301 : vector<8xf32> to vector<8x1xf32>
    %cst_92 = arith.constant 3.200000e+01 : f32
    %303 = vector.broadcast %cst_92 : f32 to vector<8x1xf32>
    %304 = arith.divf %302, %303 : vector<8x1xf32>
    %305 = vector.broadcast %297 : vector<8x1xf32> to vector<8x32xf32>
    %306 = arith.subf %293, %305 : vector<8x32xf32>
    %cst_93 = arith.constant 9.99999974E-6 : f32
    %307 = vector.broadcast %cst_93 : f32 to vector<8x1xf32>
    %308 = arith.addf %304, %307 : vector<8x1xf32>
    %309 = math.rsqrt %308 : vector<8x1xf32>
    %310 = vector.broadcast %309 : vector<8x1xf32> to vector<8x32xf32>
    %311 = arith.mulf %306, %310 : vector<8x32xf32>
    %312 = vector.shape_cast %182 : vector<32xf32> to vector<1x32xf32>
    %313 = vector.broadcast %312 : vector<1x32xf32> to vector<8x32xf32>
    %314 = arith.mulf %311, %313 : vector<8x32xf32>
    %315 = vector.shape_cast %184 : vector<32xf32> to vector<1x32xf32>
    %316 = vector.broadcast %315 : vector<1x32xf32> to vector<8x32xf32>
    %317 = arith.addf %314, %316 : vector<8x32xf32>
    %c0_94 = arith.constant 0 : index
    %c0_95 = arith.constant 0 : index
    %c0_96 = arith.constant 0 : index
    %318 = vector.load %arg6[%c0_94, %c0_95, %c0_96] : memref<1x8x32xf32, #tpu.memory_space<vmem>>, vector<1x8x32xf32>
    %319 = vector.shape_cast %318 : vector<1x8x32xf32> to vector<8x32xf32>
    %320 = vector.shape_cast %317 : vector<8x32xf32> to vector<1x8x32xf32>
    tpu.vector_store %arg6[%c0_94, %c0_95, %c0_96], %320 {strides = array<i32>} : memref<1x8x32xf32, #tpu.memory_space<vmem>>, vector<1x8x32xf32>,
    return
  }
  func.func @transform_0(%arg0: i32) -> (i32, i32, i32) {
    %c0_i32 = arith.constant 0 : i32
    %c0_i32_0 = arith.constant 0 : i32
    %c0_i32_1 = arith.constant 0 : i32
    return %arg0, %c0_i32, %c0_i32_0 : i32, i32, i32
  }
  func.func @transform_1(%arg0: i32) -> (i32, i32, i32) {
    %c0_i32 = arith.constant 0 : i32
    %c0_i32_0 = arith.constant 0 : i32
    %c0_i32_1 = arith.constant 0 : i32
    %c0_i32_2 = arith.constant 0 : i32
    return %c0_i32, %c0_i32_0, %c0_i32_1 : i32, i32, i32
  }
  func.func @transform_2(%arg0: i32) -> (i32, i32, i32) {
    %c0_i32 = arith.constant 0 : i32
    %c0_i32_0 = arith.constant 0 : i32
    %c0_i32_1 = arith.constant 0 : i32
    %c0_i32_2 = arith.constant 0 : i32
    return %c0_i32, %c0_i32_0, %c0_i32_1 : i32, i32, i32
  }
  func.func @transform_3(%arg0: i32) -> (i32, i32, i32) {
    %c0_i32 = arith.constant 0 : i32
    %c0_i32_0 = arith.constant 0 : i32
    %c0_i32_1 = arith.constant 0 : i32
    %c0_i32_2 = arith.constant 0 : i32
    return %c0_i32, %c0_i32_0, %c0_i32_1 : i32, i32, i32
  }
  func.func @transform_4(%arg0: i32) -> (i32, i32, i32) {
    %c0_i32 = arith.constant 0 : i32
    %c0_i32_0 = arith.constant 0 : i32
    %c0_i32_1 = arith.constant 0 : i32
    %c0_i32_2 = arith.constant 0 : i32
    return %c0_i32, %c0_i32_0, %c0_i32_1 : i32, i32, i32
  }
  func.func @transform_5(%arg0: i32) -> (i32, i32, i32) {
    %c0_i32 = arith.constant 0 : i32
    %c0_i32_0 = arith.constant 0 : i32
    %c0_i32_1 = arith.constant 0 : i32
    return %arg0, %c0_i32, %c0_i32_0 : i32, i32, i32
  }
}

</mosaic_0001>

<bundles_post_ra>
// kernel: tpu_custom_call.1
= control target key start
LH: loop header
LB: loop body
LE: loop exit
PB: predicated region body
PF: predicated region fallthrough
CT: control target
= control target key end

     0   :  { %10 = vsyncpa [#allocation3], 0  ;;  %s3226_s0 = inlined_call_operand.vmem [shape: f32[2,8,32], index: 0, kind: input, shape index: {}]   ;;  %s3227_s1 = inlined_call_operand.vmem [shape: f32[2,32,32], index: 1, kind: input, shape index: {}]   ;;  %s3228_s2 = inlined_call_operand.vmem [shape: f32[2,32,64], index: 2, kind: input, shape index: {}]   ;;  %s3229_s3 = inlined_call_operand.vmem [shape: f32[2,64,32], index: 3, kind: input, shape index: {}]   ;;  %s3230_s4 = inlined_call_operand.vmem [shape: f32[2,8,128], index: 4, kind: input, shape index: {}]   ;;  %s3231_s5 = inlined_call_operand.hbm [shape: f32[2,8,32], index: 5, kind: output, shape index: {}]  }
   0x1   :  { %12 = vsyncpa [#allocation3 + $0x1], 0  ;;  %s2770_s18 = smov 0   ;;  %s2772_s19 = smov 0  }
   0x2   :  { %s2774_s20 = smov 0   ;;  %s2776_s21 = smov 0  }
   0x3 LB: > { %s2791_s22 = sadd.s32 4294967295, %s2728_s21   ;;  %s2231_s23 = sadd.s32 4294967294, %s2728_s21   ;;  %s2728_s21 = sphi %s2776_s21, %s3237_s21   ;;  %s2724_s20 = sphi %s2774_s20, %s3236_s20   ;;  %s2720_s19 = sphi %s2772_s19, %s3235_s19   ;;  %s2716_s18 = sphi %s2770_s18, %s3234_s18  }
   0x4   : > { %s2795_s24 = sadd.s32 1, %s2728_s21   ;;  %s135_s25 = sadd.s32 1, %s2724_s20 }
   0x5   : > { %s132_s26 = ssub.s32 %s2728_s21, %s2795_s24  ;;  %p145_p0 = scmp.ne.s32.totalorder %s2724_s20, %s2720_s19 }
   0x6   : > { %p133_p1 = scmp.eq.s32.totalorder %s132_s26, 0  ;;  %p146_p2 = scmp.eq.s32.totalorder %s2791_s22, 1 }
   0x7   : > { %p151_p3 = scmp.ne.s32.totalorder %s2720_s19, %s2716_s18  ;;  %p152_p4 = scmp.eq.s32.totalorder %s2231_s23, 1 }
   0x8   : > { %s2806_s27 = scalar_select %p133_p1, %s2724_s20, %s135_s25  }
   0x9   : > { %p2808_p5 = por %p146_p2, %p145_p0  ;;  %p2812_p6 = por %p152_p4, %p151_p3 }
   0xa   : > { %p2234_p7 = scmp.ge.s32.totalorder %s2728_s21, 1  ;;  %p189_p8 = scmp.lt.s32.totalorder %s2728_s21, 3 }
   0xc   : > { %p190_p9 = pnand %p2234_p7, %p189_p8 }
   0xd   : > { %v227_v0 = vld [vmem:[%s3227_s1] sm:$0xff] (!%p190_p9)  ;;  %v228_v1 = vld [vmem:[%s3227_s1 + $0x8] sm:$0xff] (!%p190_p9)  ;;  %v229_v2 = vld [vmem:[%s3227_s1 + $0x10] sm:$0xff] (!%p190_p9)  ;;  %v2730_v3 = vmov (!%p190_p9), 0.0|0.0   ;;  %vm2731_vm0 = vmmov (!%p190_p9), 0   ;;  %v2732_v6 = vmov (!%p190_p9), 0.0   ;;  %v221_v9 = vlaneseq (!%p190_p9) }
   0xe   : > { %193 = sbr.rel (%p190_p9) target bundleno = 4608 (0x1200), region = 40  ;;  %2522 = vmatprep.subr.bf16.mxu0 (!%p190_p9), %v2730_v3  ;;  %v2523_v4 = vpack.c.bf16 (!%p190_p9), %v228_v1, %v227_v0  ;;  %v230_v5 = vld [vmem:[%s3227_s1 + $0x18] sm:$0xff] (!%p190_p9)  ;;  %2368 = vmatprep.mubr.msk.f32.mxu0 (!%p190_p9), %vm2731_vm0, %v2732_v6  ;;  %p216_p10 = scmp.lt.s32.totalorder (!%p190_p9), %s2791_s22, 1  ;;  %vm248_vm1 = vcmask (!%p190_p9), 261120   ;;  %v2855_v12 = vld [vmem:[%s3230_s4] sm:$0xff] (!%p190_p9)  ;;  %vm322_vm2 = vcmask (!%p190_p9), 64512  }
   0xf   : > { %2376 = vmatprep.subr.mxu1 (!%p190_p9), %v2732_v6  ;;  %2378 = vmatprep.mubr.msk.f32.mxu1 (!%p190_p9), %vm2731_vm0, %v2732_v6  ;;  %v2526_v7 = vpack.c.bf16 (!%p190_p9), %v230_v5, %v229_v2  ;;  %v2849_v10 = vshrl.u32 (!%p190_p9), %v221_v9, 7  ;;  %s2733_s26 = smov (!%p190_p9), 104   ;;  %s2734_s30 = smov (!%p190_p9), 120   ;;  %v224_v20 = vand.u32 (!%p190_p9), 127, %v221_v9  ;;  %vm978_vm4 = vcmask (!%p190_p9), 130048  }
  0x10   : > { %2524 = vmatpush3.bf16.msra.mxu0 (!%p190_p9), %v2523_v4  ;;  %s2735_s6 = smov (!%p190_p9), 112   ;;  %s2736_s7 = smov (!%p190_p9), 8   ;;  %vm980_vm5 = vcmask (!%p190_p9), 195584   ;;  %vm1095_vm6 = vcmask (!%p190_p9), 523264  }
  0x11   : > { %2525 = vmatprep.subr.bf16.mxu0 (!%p190_p9), %v2730_v3  ;;  %v246_v11 = vsub.s32 (!%p190_p9), 0, %v2849_v10  ;;  %vm225_vm3 = vcmp.gt.s32.totalorder (!%p190_p9), %v224_v20, %v2849_v10  ;;  %s2737_s8 = smov (!%p190_p9), 16   ;;  %s2738_s9 = smov (!%p190_p9), 24  }
  0x12   : > { %v2898_v22 = vsel (!%p190_p9), %vm225_vm3, -inf, %v2732_v6  ;;  %s213_s16 = sand.u32 (!%p190_p9), 1, %s2720_s19   ;;  %s2287_s23 = sshll.u32 (!%p190_p9), %s2791_s22, 7 }
  0x13   : > { %v247_v13 = vrot.slane (!%p190_p9), %v2855_v12, %v246_v11 }
  0x14   : > { %2527 = vmatpush3.bf16.msra.mxu0 (!%p190_p9), %v2526_v7 }
  0x15   : > { %s217_s13 = scalar_select %p216_p10, %s2791_s22, 1  ;;  %2371 = vmatprep.subr.mxu0 %v2732_v6 }
  0x16   : > { %s2739_s22 = smov [#allocation2]  }
  0x17   : > { %s2236_s14 = sshll.u32 %s217_s13, 3  ;;  %s3183_s13 = scalar_lea.hbm %s3231_s5, %s2287_s23 }
  0x18   : > { %s219_s17 = scalar_lea.vmem %s3226_s0, %s2236_s14 }
  0x19   : > { %v2842_v8 = vld [vmem:[%s219_s17] sm:$0xff]  ;;  %s2235_s17 = sshll.u32 %s213_s16, 3 }
  0x1a   : > { %2369 = vmatmul.mubr.msk.f32.vlgmr.msra.gmra.mrb[0].mxu0 %vm248_vm1, %v2842_v8  ;;  %s215_s25 = scalar_lea.vmem [#allocation2], %s2235_s17 }
  0x1b   : > { %2373 = vmatprep.mubr.msk.f32.mxu0 %vm2731_vm0, %v2732_v6  ;;  %s2172_s10 = sshll.u32 %s215_s25, 4  ;;  %s3185_s10 = int_to_ptr.vmem [resolvable:$true] %s2172_s10 }
  0xed   : > { %v318_v14 = vpop.f32.mrb[0].mxu0 }
  0xee   : > { %v319_v15 = vadd.f32 %v318_v14, %v247_v13  ;;  %v2370_v16 = vpop.f32.mrb[1].mxu0 }
  0xf0   : > { %804 = vrot.lane.b32.xlu1 %v319_v15, %s2733_s26  ;;  %482 = vrot.lane.b32.xlu0 %v319_v15, %s2734_s30 }
  0xf1   : > { %2372 = vmatpush3.xpose.msk.msra.mxu0 %vm322_vm2, %v319_v15  ;;  %2377 = vmatpush3.msra.mxu1 %v319_v15 }
  0xf2   : > { %2381 = vmatprep.subr.mxu0 %v2732_v6  ;;  %2386 = vmatprep.subr.mxu1 %v2732_v6 }
  0xf4   : > { %2374 = vmatmul.mubr.msk.f32.vlgmr.msra.gmra.mrb[2].mxu0 %vm322_vm2, %v319_v15  ;;  %643 = vrot.lane.b32.xlu0 %v319_v15, %s2735_s6 }
  0xf5   : > { %2383 = vmatprep.mubr.msk.f32.mxu0 %vm2731_vm0, %v2732_v6 }
 0x162   : > { %v2869_v17 = vpop.permute.xlu0 %482  ;;  %v2883_v19 = vpop.permute.xlu1 %804 }
 0x163   : > { %2382 = vmatpush3.xpose.msk.msra.mxu0 %vm322_vm2, %v2869_v17 }
 0x164   : > { %2391 = vmatprep.subr.mxu0 %v2732_v6 }
 0x166   : > { %v2874_v18 = vpop.permute.xlu0 %643  ;;  %2384 = vmatmul.mubr.msk.f32.vlgmr.msra.gmra.mrb[4].mxu0 %vm322_vm2, %v2869_v17 }
 0x167   : > { %2392 = vmatpush3.xpose.msk.msra.mxu0 %vm322_vm2, %v2874_v18  ;;  %2393 = vmatprep.mubr.msk.f32.mxu0 %vm2731_vm0, %v2732_v6 }
 0x168   : > { %2401 = vmatprep.subr.mxu0 %v2732_v6 }
 0x16a   : > { %2394 = vmatmul.mubr.msk.f32.vlgmr.msra.gmra.mrb[6].mxu0 %vm322_vm2, %v2874_v18 }
 0x16b   : > { %2402 = vmatpush3.xpose.msk.msra.mxu0 %vm322_vm2, %v2883_v19  ;;  %2403 = vmatprep.mubr.msk.f32.mxu0 %vm2731_vm0, %v2732_v6 }
 0x16c   : > { %2528 = vmatprep.subr.bf16.mxu0 %v2730_v3 }
 0x16e   : > { %2404 = vmatmul.mubr.msk.f32.vlgmr.msra.gmra.mrb[8].mxu0 %vm322_vm2, %v2883_v19 }
 0x16f   : > { %2419 = vmatprep.mubr.msk.f32.mxu0 %vm2731_vm0, %v2732_v6 }
 0x1c7   : > { %v392_v21 = vpop.f32.mrb[2].mxu0 }
 0x1c8   : > { %v396_v23 = vmul.f32 0.17677669, %v392_v21  ;;  %v2375_v24 = vpop.f32.mrb[3].mxu0 }
 0x1ca   : > { %v397_v25 = vadd.f32 %v396_v23, %v2898_v22 }
 0x1cc   : > { %v398_v26 = vsel %vm322_vm2, %v397_v25, -inf }
 0x1cd   : > { %399 = vmax.xlane.f32.xlu1 %v398_v26 }
 0x239   : > { %v552_v27 = vpop.f32.mrb[4].mxu0 }
 0x23a   : > { %v556_v28 = vmul.f32 0.17677669, %v552_v27  ;;  %v2385_v29 = vpop.f32.mrb[5].mxu0 }
 0x23c   : > { %v557_v30 = vadd.f32 %v556_v28, %v2898_v22 }
 0x23d   : > { %v713_v31 = vpop.f32.mrb[6].mxu0 }
 0x23e   : > { %v717_v32 = vmul.f32 0.17677669, %v713_v31  ;;  %v2395_v33 = vpop.f32.mrb[7].mxu0  ;;  %v558_v34 = vsel %vm322_vm2, %v557_v30, -inf }
 0x23f   : > { %559 = vmax.xlane.f32.xlu0 %v558_v34 }
 0x240   : > { %v718_v35 = vadd.f32 %v717_v32, %v2898_v22 }
 0x241   : > { %v874_v36 = vpop.f32.mrb[8].mxu0 }
 0x242   : > { %v878_v37 = vmul.f32 0.17677669, %v874_v36  ;;  %v2405_v38 = vpop.f32.mrb[9].mxu0  ;;  %v719_v39 = vsel %vm322_vm2, %v718_v35, -inf }
 0x243   : > { %720 = vmax.xlane.f32.xlu0 %v719_v39  ;;  %v231_v38 = vld [vmem:[%s3228_s2] sm:$0xff]  ;;  %v232_v39 = vld [vmem:[%s3228_s2 + $0x8] sm:$0xff] }
 0x244   : > { %v879_v40 = vadd.f32 %v878_v37, %v2898_v22 }
 0x246   : > { %v880_v41 = vsel %vm322_vm2, %v879_v40, -inf }
 0x247   : > { %881 = vmax.xlane.f32.xlu1 %v880_v41  ;;  %v234_v41 = vld [vmem:[%s3228_s2 + $0x18] sm:$0xff] }
 0x25a   : > { %v400_v42 = vpop.xlane.xlu1 %399 }
 0x25b   : > { %v401_v43 = vsub.f32 %v397_v25, %v400_v42 }
 0x25d   : > { %v402_v44 = vmul.f32 1.442695, %v401_v43 }
 0x25f   : > { %2618 = vpow2.f32 %v402_v44 }
 0x269   : > { %v2619_v45 = vpop.eup %2618 }
 0x26a   : > { %v404_v46 = vsel %vm322_vm2, %v2619_v45, 0.0 }
 0x26b   : > { %405 = vadd.xlane.f32.xlu0 %v404_v46  ;;  %v999_v46 = vsub.s32 3, %v2849_v10 }
 0x2cc   : > { %v560_v47 = vpop.xlane.xlu0 %559 }
 0x2cd   : > { %v561_v48 = vsub.f32 %v557_v30, %v560_v47  ;;  %v1004_v47 = vsub.s32 4, %v2849_v10 }
 0x2cf   : > { %v562_v49 = vmul.f32 1.442695, %v561_v48  ;;  %v1000_v48 = vrot.slane %v2855_v12, %v999_v46 }
 0x2d0   : > { %v721_v50 = vpop.xlane.xlu0 %720 }
 0x2d1   : > { %2620 = vpow2.f32 %v562_v49  ;;  %v722_v51 = vsub.f32 %v718_v35, %v721_v50 }
 0x2d3   : > { %v723_v52 = vmul.f32 1.442695, %v722_v51  ;;  %v1005_v51 = vrot.slane %v2855_v12, %v1004_v47 }
 0x2d4   : > { %v882_v53 = vpop.xlane.xlu1 %881 }
 0x2d5   : > { %2622 = vpow2.f32 %v723_v52  ;;  %v883_v54 = vsub.f32 %v879_v40, %v882_v53  ;;  %v2529_v40 = vpack.c.bf16 %v232_v39, %v231_v38 }
 0x2d7   : > { %v884_v55 = vmul.f32 1.442695, %v883_v54  ;;  %2530 = vmatpush3.bf16.msra.mxu0 %v2529_v40  ;;  %v235_v54 = vld [vmem:[%s3229_s3] sm:$0xff]  ;;  %v1185_v40 = vsub.s32 5, %v2849_v10 }
 0x2d8   : > { %2531 = vmatprep.subr.bf16.mxu0 %v2730_v3 }
 0x2d9   : > { %2624 = vpow2.f32 %v884_v55  ;;  %v236_v55 = vld [vmem:[%s3229_s3 + $0x8] sm:$0xff] }
 0x2db   : > { %v2621_v56 = vpop.eup %2620 }
 0x2dc   : > { %v564_v57 = vsel %vm322_vm2, %v2621_v56, 0.0 }
 0x2dd   : > { %565 = vadd.xlane.f32.xlu1 %v564_v57  ;;  %v237_v57 = vld [vmem:[%s3229_s3 + $0x10] sm:$0xff] }
 0x2df   : > { %v2623_v58 = vpop.eup %2622 }
 0x2e0   : > { %v725_v59 = vsel %vm322_vm2, %v2623_v58, 0.0 }
 0x2e1   : > { %726 = vadd.xlane.f32.xlu0 %v725_v59 }
 0x2e3   : > { %v2625_v60 = vpop.eup %2624 }
 0x2e4   : > { %v886_v61 = vsel %vm322_vm2, %v2625_v60, 0.0 }
 0x2e5   : > { %887 = vadd.xlane.f32.xlu1 %v886_v61  ;;  %v240_v61 = vld [vmem:[%s3229_s3 + $0x28] sm:$0xff] }
 0x2f8   : > { %v406_v62 = vpop.xlane.xlu0 %405 }
 0x2f9   : > { %2626 = vrcp.f32 %v406_v62 }
 0x303   : > { %v2627_v63 = vpop.eup %2626 }
 0x304   : > { %v408_v0 = vmul.f32 %v2627_v63, %v2619_v45  ;;  %v241_v63 = vld [vmem:[%s3229_s3 + $0x30] sm:$0xff] }
 0x306   : > { %2379 = vmatmul.mubr.msk.f32.vlgmr.msra.gmra.mrb[0].mxu1 %vm322_vm2, %v408_v0  ;;  %v242_v0 = vld [vmem:[%s3229_s3 + $0x38] sm:$0xff] }
 0x307   : > { %2387 = vmatpush3.msra.mxu1 %v2869_v17  ;;  %2388 = vmatprep.mubr.msk.f32.mxu1 %vm2731_vm0, %v2732_v6 }
 0x308   : > { %2396 = vmatprep.subr.mxu1 %v2732_v6 }
 0x36a   : > { %v566_v1 = vpop.xlane.xlu1 %565 }
 0x36b   : > { %2628 = vrcp.f32 %v566_v1  ;;  %v2544_v1 = vpack.c.bf16 %v242_v0, %v241_v63 }
 0x36e   : > { %v727_v2 = vpop.xlane.xlu0 %726 }
 0x36f   : > { %2630 = vrcp.f32 %v727_v2  ;;  %v1009_v2 = vsub.s32 1, %v2849_v10 }
 0x372   : > { %v888_v4 = vpop.xlane.xlu1 %887 }
 0x373   : > { %2632 = vrcp.f32 %v888_v4  ;;  %v1010_v4 = vrot.slane %v2855_v12, %v1009_v2 }
 0x375   : > { %v2629_v5 = vpop.eup %2628 }
 0x376   : > { %v568_v7 = vmul.f32 %v2629_v5, %v2621_v56  ;;  %v2535_v56 = vpack.c.bf16 %v236_v55, %v235_v54 }
 0x378   : > { %2389 = vmatmul.mubr.msk.f32.vlgmr.msra.gmra.mrb[2].mxu1 %vm322_vm2, %v568_v7 }
 0x379   : > { %v2631_v9 = vpop.eup %2630  ;;  %2397 = vmatpush3.msra.mxu1 %v2874_v18  ;;  %2398 = vmatprep.mubr.msk.f32.mxu1 %vm2731_vm0, %v2732_v6 }
 0x37a   : > { %v729_v13 = vmul.f32 %v2631_v9, %v2623_v58  ;;  %2406 = vmatprep.subr.mxu1 %v2732_v6  ;;  %v238_v58 = vld [vmem:[%s3229_s3 + $0x18] sm:$0xff] }
 0x37b   : > { %v2538_v59 = vpack.c.bf16 %v238_v58, %v237_v57 }
 0x37c   : > { %2399 = vmatmul.mubr.msk.f32.vlgmr.msra.gmra.mrb[4].mxu1 %vm322_vm2, %v729_v13 }
 0x37d   : > { %v2633_v14 = vpop.eup %2632  ;;  %2407 = vmatpush3.msra.mxu1 %v2883_v19  ;;  %2408 = vmatprep.mubr.msk.f32.mxu1 %vm2731_vm0, %v2732_v6 }
 0x37e   : > { %v890_v15 = vmul.f32 %v2633_v14, %v2625_v60  ;;  %2534 = vmatprep.subr.bf16.mxu1 %v2730_v3  ;;  %v239_v60 = vld [vmem:[%s3229_s3 + $0x20] sm:$0xff] }
 0x37f   : > { %v2541_v62 = vpack.c.bf16 %v240_v61, %v239_v60 }
 0x380   : > { %2409 = vmatmul.mubr.msk.f32.vlgmr.msra.gmra.mrb[6].mxu1 %vm322_vm2, %v890_v15 }
 0x381   : > { %2438 = vmatprep.mubr.msk.f32.mxu1 %vm2731_vm0, %v2732_v6  ;;  %2536 = vmatpush3.bf16.msra.mxu1 %v2535_v56 }
 0x382   : > { %2537 = vmatprep.subr.bf16.mxu1 %v2730_v3 }
 0x385   : > { %2539 = vmatpush3.bf16.msra.mxu1 %v2538_v59 }
 0x386   : > { %2540 = vmatprep.subr.bf16.mxu1 %v2730_v3 }
 0x389   : > { %2542 = vmatpush3.bf16.msra.mxu1 %v2541_v62 }
 0x38a   : > { %2543 = vmatprep.subr.bf16.mxu1 %v2730_v3 }
 0x38d   : > { %2545 = vmatpush3.bf16.msra.mxu1 %v2544_v1 }
 0x38e   : > { %2457 = vmatprep.subr.mxu1 %v2732_v6 }
 0x3d9   : > { %v478_v16 = vpop.f32.mrb[0].mxu1 }
 0x3da   : > { %v2380_v17 = vpop.f32.mrb[1].mxu1 }
 0x44b   : > { %v639_v18 = vpop.f32.mrb[2].mxu1 }
 0x44c   : > { %966 = vrot.lane.b32.xlu0 %v639_v18, %s2736_s7  ;;  %v2390_v20 = vpop.f32.mrb[3].mxu1  ;;  %v1093_v18 = vsub.s32 2, %v2849_v10 }
 0x44e   : > { %v1094_v20 = vrot.slane %v2855_v12, %v1093_v18 }
 0x44f   : > { %v800_v21 = vpop.f32.mrb[4].mxu1 }
 0x450   : > { %970 = vrot.lane.b32.xlu1 %v800_v21, %s2737_s8  ;;  %v2400_v19 = vpop.f32.mrb[5].mxu1 }
 0x453   : > { %v961_v23 = vpop.f32.mrb[6].mxu1 }
 0x454   : > { %974 = vrot.lane.b32.xlu1 %v961_v23, %s2738_s9  ;;  %v2410_v24 = vpop.f32.mrb[7].mxu1 }
 0x4be   : > { %v967_v25 = vpop.permute.xlu0 %966 }
 0x4bf   : > { %v977_v27 = vsel %vm322_vm2, %v478_v16, %v967_v25 }
 0x4c2   : > { %v971_v26 = vpop.permute.xlu1 %970 }
 0x4c3   : > { %v979_v28 = vsel %vm978_vm4, %v977_v27, %v971_v26 }
 0x4c6   : > { %v975_v29 = vpop.permute.xlu1 %974 }
 0x4c7   : > { %v981_v30 = vsel %vm980_vm5, %v979_v28, %v975_v29 }
 0x4c8   : > { %v982_v31 = vadd.f32 %v981_v30, %v2842_v8  ;;  %v233_v8 = vld [vmem:[%s3228_s2 + $0x10] sm:$0xff] }
 0x4c9   : > { %v2532_v42 = vpack.c.bf16 %v234_v41, %v233_v8  ;;  %v1190_v8 = vsub.s32 6, %v2849_v10  ;;  %v1186_v41 = vrot.slane %v2855_v12, %v1185_v40 }
 0x4ca   : > { %v983_v32 = vsel %vm248_vm1, %v982_v31, 0.0 }
 0x4cb   : > { %984 = vadd.xlane.f32.xlu0 %v983_v32  ;;  %2533 = vmatpush3.bf16.msra.mxu0 %v2532_v42  ;;  %v2254_v32 = vld [vmem:[%s3227_s1 + $0x28] sm:$0xff] }
 0x4cc   : > { %2546 = vmatprep.subr.bf16.mxu0 %v2730_v3 }
 0x558   : > { %v985_v33 = vpop.xlane.xlu0 %984 }
 0x559   : > { %v987_v34 = vmul.f32 0.03125, %v985_v33 }
 0x55b   : > { %v988_v35 = vsub.f32 %v982_v31, %v987_v34  ;;  %v2253_v31 = vld [vmem:[%s3227_s1 + $0x20] sm:$0xff]  ;;  %v2255_v34 = vld [vmem:[%s3227_s1 + $0x30] sm:$0xff] }
 0x55c   : > { %v2547_v33 = vpack.c.bf16 %v2254_v32, %v2253_v31 }
 0x55d   : > { %v989_v36 = vmul.f32 %v988_v35, %v988_v35 }
 0x55f   : > { %v990_v37 = vsel %vm248_vm1, %v989_v36, 0.0 }
 0x560   : > { %991 = vadd.xlane.f32.xlu1 %v990_v37 }
 0x5ed   : > { %v992_v43 = vpop.xlane.xlu1 %991 }
 0x5ee   : > { %v993_v44 = vmul.f32 0.03125, %v992_v43 }
 0x5f0   : > { %v994_v45 = vadd.f32 1e-05, %v993_v44  ;;  %v1191_v44 = vrot.slane %v2855_v12, %v1190_v8 }
 0x5f2   : > { %2634 = vrsqrt.f32 %v994_v45 }
 0x5fc   : > { %v2635_v49 = vpop.eup %2634 }
 0x5fd   : > { %v996_v50 = vmul.f32 %v2635_v49, %v988_v35  ;;  %v2256_v35 = vld [vmem:[%s3227_s1 + $0x38] sm:$0xff]  ;;  %v3036_v49 = vld [vmem:[%s3230_s4 + $0x8] sm:$0xff] }
 0x5fe   : > { %v2550_v36 = vpack.c.bf16 %v2256_v35, %v2255_v34 }
 0x5ff   : > { %v1001_v52 = vmul.f32 %v1000_v48, %v996_v50  ;;  %v1217_v50 = vrot.slane %v3036_v49, %v246_v11 }
 0x601   : > { %v1006_v53 = vadd.f32 %v1005_v51, %v1001_v52 }
 0x603   : > { %2420 = vmatmul.mubr.msk.f32.vlgmr.msra.gmra.mrb[10].mxu0 %vm248_vm1, %v1006_v53 }
 0x604   : > { %2449 = vmatprep.mubr.msk.f32.mxu0 %vm2731_vm0, %v2732_v6  ;;  %2548 = vmatpush3.bf16.msra.mxu0 %v2547_v33 }
 0x605   : > { %2549 = vmatprep.subr.bf16.mxu0 %v2730_v3 }
 0x608   : > { %2551 = vmatpush3.bf16.msra.mxu0 %v2550_v36 }
 0x609   : > { %2452 = vmatprep.subr.mxu0 %v2732_v6 }
 0x6d6   : > { %v1080_v5 = vpop.f32.mrb[10].mxu0 }
 0x6d7   : > { %v1081_v7 = vadd.f32 %v1080_v5, %v1010_v4  ;;  %v2421_v9 = vpop.f32.mrb[11].mxu0 }
 0x6d9   : > { %v2251_v13 = vmul.f32 -1.442695, %v1081_v7 }
 0x6db   : > { %2636 = vpow2.f32 %v2251_v13 }
 0x6e5   : > { %v2637_v14 = vpop.eup %2636 }
 0x6e6   : > { %v1087_v15 = vadd.f32 1.0, %v2637_v14 }
 0x6e8   : > { %2638 = vrcp.f32 %v1087_v15 }
 0x6f2   : > { %v2639_v16 = vpop.eup %2638 }
 0x6f3   : > { %v1090_v17 = vmul.f32 %v2639_v16, %v1081_v7 }
 0x6f5   : > { %2439 = vmatmul.mubr.msk.f32.vlgmr.msra.gmra.mrb[8].mxu1 %vm1095_vm6, %v1090_v17 }
 0x6f6   : > { %2459 = vmatprep.mubr.msk.f32.mxu1 %vm2731_vm0, %v2732_v6 }
 0x7c8   : > { %v1165_v21 = vpop.f32.mrb[8].mxu1 }
 0x7c9   : > { %v1166_v19 = vadd.f32 %v1165_v21, %v1094_v20  ;;  %v2440_v23 = vpop.f32.mrb[9].mxu1 }
 0x7cb   : > { %v1169_v24 = vadd.f32 %v1166_v19, %v1006_v53 }
 0x7cd   : > { %v1170_v25 = vsel %vm248_vm1, %v1169_v24, 0.0 }
 0x7ce   : > { %1171 = vadd.xlane.f32.xlu0 %v1170_v25 }
 0x85b   : > { %v1172_v26 = vpop.xlane.xlu0 %1171 }
 0x85c   : > { %v1173_v27 = vmul.f32 0.03125, %v1172_v26 }
 0x85e   : > { %v1174_v28 = vsub.f32 %v1169_v24, %v1173_v27 }
 0x860   : > { %v1175_v29 = vmul.f32 %v1174_v28, %v1174_v28 }
 0x862   : > { %v1176_v30 = vsel %vm248_vm1, %v1175_v29, 0.0 }
 0x863   : > { %1177 = vadd.xlane.f32.xlu0 %v1176_v30 }
 0x8f0   : > { %v1178_v37 = vpop.xlane.xlu0 %1177 }
 0x8f1   : > { %v1179_v38 = vmul.f32 0.03125, %v1178_v37 }
 0x8f3   : > { %v1180_v39 = vadd.f32 1e-05, %v1179_v38 }
 0x8f5   : > { %2640 = vrsqrt.f32 %v1180_v39 }
 0x8ff   : > { %v2641_v42 = vpop.eup %2640 }
 0x900   : > { %v1182_v43 = vmul.f32 %v2641_v42, %v1174_v28 }
 0x902   : > { %v1187_v45 = vmul.f32 %v1186_v41, %v1182_v43 }
 0x904   : > { %v3027_v48 = vadd.f32 %v1191_v44, %v1187_v45 }
 0x906   : > { %2450 = vmatmul.mubr.msk.f32.vlgmr.msra.gmra.mrb[12].mxu0 %vm248_vm1, %v3027_v48 }
 0x907   : > { %2454 = vmatprep.mubr.msk.f32.mxu0 %vm2731_vm0, %v2732_v6 }
 0x9d9   : > { %v1287_v51 = vpop.f32.mrb[12].mxu0 }
 0x9da   : > { %v1288_v12 = vadd.f32 %v1287_v51, %v1217_v50  ;;  %v2451_v52 = vpop.f32.mrb[13].mxu0 }
 0x9dc   : > { %1611 = vrot.lane.b32.xlu0 %v1288_v12, %s2735_s6  ;;  %1450 = vrot.lane.b32.xlu1 %v1288_v12, %s2734_s30  ;;  %s2666_s30 = scalar_lea.vmem %s3185_s10, 128  ;;  %s2670_s6 = sshll.u32 %s2739_s22, 4  ;;  %s2671_s6 = int_to_ptr.vmem [resolvable:$false] %s2670_s6 }
 0x9dd   : > { %2453 = vmatpush3.xpose.msk.msra.mxu0 %vm322_vm2, %v1288_v12  ;;  %2458 = vmatpush3.msra.mxu1 %v1288_v12  ;;  %p2667_p11 = scmp.ne.s32.totalorder %s3185_s10, %s2666_s30  ;;  %p2673_p0 = scmp.lt.s32.totalorder %s3185_s10, %s2671_s6 }
 0x9de   : > { %2462 = vmatprep.subr.mxu0 %v2732_v6  ;;  %2467 = vmatprep.subr.mxu1 %v2732_v6 }
 0x9df   : > { %p2668_p12 = pnand %p2667_p11, %p2808_p5 }
 0x9e0   : > { %2455 = vmatmul.mubr.msk.f32.vlgmr.msra.gmra.mrb[14].mxu0 %vm322_vm2, %v1288_v12  ;;  %1772 = vrot.lane.b32.xlu1 %v1288_v12, %s2733_s26  ;;  %s2159_s26 = scalar_lea.sflag [#allocation3], %s213_s16 }
 0x9e1   : > { %2464 = vmatprep.mubr.msk.f32.mxu0 %vm2731_vm0, %v2732_v6  ;;  %p2669_p13 = pneg %p2668_p12 }
 0xa4e   : > { %v3050_v11 = vpop.permute.xlu1 %1450  ;;  %v3055_v53 = vpop.permute.xlu0 %1611 }
 0xa4f   : > { %2463 = vmatpush3.xpose.msk.msra.mxu0 %vm322_vm2, %v3050_v11 }
 0xa50   : > { %2472 = vmatprep.subr.mxu0 %v2732_v6 }
 0xa52   : > { %2465 = vmatmul.mubr.msk.f32.vlgmr.msra.gmra.mrb[16].mxu0 %vm322_vm2, %v3050_v11  ;;  %v3064_v54 = vpop.permute.xlu1 %1772 }
 0xa53   : > { %2473 = vmatpush3.xpose.msk.msra.mxu0 %vm322_vm2, %v3055_v53  ;;  %2474 = vmatprep.mubr.msk.f32.mxu0 %vm2731_vm0, %v2732_v6 }
 0xa54   : > { %2482 = vmatprep.subr.mxu0 %v2732_v6 }
 0xa56   : > { %2475 = vmatmul.mubr.msk.f32.vlgmr.msra.gmra.mrb[18].mxu0 %vm322_vm2, %v3055_v53 }
 0xa57   : > { %2483 = vmatpush3.xpose.msk.msra.mxu0 %vm322_vm2, %v3064_v54  ;;  %2484 = vmatprep.mubr.msk.f32.mxu0 %vm2731_vm0, %v2732_v6 }
 0xa58   : > { %2552 = vmatprep.subr.bf16.mxu0 %v2730_v3 }
 0xa5a   : > { %2485 = vmatmul.mubr.msk.f32.vlgmr.msra.gmra.mrb[20].mxu0 %vm322_vm2, %v3064_v54 }
 0xa5b   : > { %2500 = vmatprep.mubr.msk.f32.mxu0 %vm2731_vm0, %v2732_v6 }
 0xab3   : > { %v1360_v55 = vpop.f32.mrb[14].mxu0 }
 0xab4   : > { %v1364_v56 = vmul.f32 0.17677669, %v1360_v55  ;;  %v2456_v57 = vpop.f32.mrb[15].mxu0 }
 0xab6   : > { %v1365_v58 = vadd.f32 %v1364_v56, %v2898_v22 }
 0xab8   : > { %v1366_v59 = vsel %vm322_vm2, %v1365_v58, -inf }
 0xab9   : > { %1367 = vmax.xlane.f32.xlu1 %v1366_v59 }
 0xb25   : > { %v1520_v60 = vpop.f32.mrb[16].mxu0 }
 0xb26   : > { %v1524_v61 = vmul.f32 0.17677669, %v1520_v60  ;;  %v2466_v62 = vpop.f32.mrb[17].mxu0 }
 0xb28   : > { %v1525_v63 = vadd.f32 %v1524_v61, %v2898_v22 }
 0xb29   : > { %v1681_v0 = vpop.f32.mrb[18].mxu0 }
 0xb2a   : > { %v1685_v1 = vmul.f32 0.17677669, %v1681_v0  ;;  %v2476_v4 = vpop.f32.mrb[19].mxu0  ;;  %v1526_v5 = vsel %vm322_vm2, %v1525_v63, -inf }
 0xb2b   : > { %1527 = vmax.xlane.f32.xlu0 %v1526_v5 }
 0xb2c   : > { %v1686_v7 = vadd.f32 %v1685_v1, %v2898_v22 }
 0xb2d   : > { %v1842_v9 = vpop.f32.mrb[20].mxu0 }
 0xb2e   : > { %v1846_v13 = vmul.f32 0.17677669, %v1842_v9  ;;  %v2486_v14 = vpop.f32.mrb[21].mxu0  ;;  %v1687_v15 = vsel %vm322_vm2, %v1686_v7, -inf }
 0xb2f   : > { %1688 = vmax.xlane.f32.xlu0 %v1687_v15 }
 0xb30   : > { %v1847_v16 = vadd.f32 %v1846_v13, %v2898_v22 }
 0xb32   : > { %v1848_v17 = vsel %vm322_vm2, %v1847_v16, -inf }
 0xb33   : > { %1849 = vmax.xlane.f32.xlu1 %v1848_v17  ;;  %v2257_v17 = vld [vmem:[%s3228_s2 + $0x20] sm:$0xff] }
 0xb46   : > { %v1368_v20 = vpop.xlane.xlu1 %1367 }
 0xb47   : > { %v1369_v21 = vsub.f32 %v1365_v58, %v1368_v20  ;;  %v2258_v20 = vld [vmem:[%s3228_s2 + $0x28] sm:$0xff] }
 0xb49   : > { %v1370_v19 = vmul.f32 1.442695, %v1369_v21  ;;  %v2553_v21 = vpack.c.bf16 %v2258_v20, %v2257_v17 }
 0xb4b   : > { %2642 = vpow2.f32 %v1370_v19  ;;  %2554 = vmatpush3.bf16.msra.mxu0 %v2553_v21  ;;  %v2260_v19 = vld [vmem:[%s3228_s2 + $0x38] sm:$0xff] }
 0xb4c   : > { %2555 = vmatprep.subr.bf16.mxu0 %v2730_v3 }
 0xb55   : > { %v2643_v23 = vpop.eup %2642 }
 0xb56   : > { %v1372_v24 = vsel %vm322_vm2, %v2643_v23, 0.0 }
 0xb57   : > { %1373 = vadd.xlane.f32.xlu0 %v1372_v24 }
 0xbb8   : > { %v1528_v25 = vpop.xlane.xlu0 %1527 }
 0xbb9   : > { %v1529_v26 = vsub.f32 %v1525_v63, %v1528_v25 }
 0xbbb   : > { %v1530_v27 = vmul.f32 1.442695, %v1529_v26 }
 0xbbc   : > { %v1689_v28 = vpop.xlane.xlu0 %1688 }
 0xbbd   : > { %2644 = vpow2.f32 %v1530_v27  ;;  %v1690_v29 = vsub.f32 %v1686_v7, %v1689_v28  ;;  %v1965_v27 = vrot.slane %v3036_v49, %v999_v46  ;;  %v2263_v46 = vld [vmem:[%s3229_s3 + $0x50] sm:$0xff] }
 0xbbf   : > { %v1691_v30 = vmul.f32 1.442695, %v1690_v29 }
 0xbc0   : > { %v1850_v31 = vpop.xlane.xlu1 %1849 }
 0xbc1   : > { %2646 = vpow2.f32 %v1691_v30  ;;  %v1851_v22 = vsub.f32 %v1847_v16, %v1850_v31  ;;  %v1970_v30 = vrot.slane %v3036_v49, %v1004_v47  ;;  %v2264_v47 = vld [vmem:[%s3229_s3 + $0x58] sm:$0xff] }
 0xbc3   : > { %v1852_v32 = vmul.f32 1.442695, %v1851_v22 }
 0xbc5   : > { %2648 = vpow2.f32 %v1852_v32  ;;  %v2261_v32 = vld [vmem:[%s3229_s3 + $0x40] sm:$0xff] }
 0xbc7   : > { %v2645_v33 = vpop.eup %2644 }
 0xbc8   : > { %v1532_v34 = vsel %vm322_vm2, %v2645_v33, 0.0 }
 0xbc9   : > { %1533 = vadd.xlane.f32.xlu1 %v1532_v34 }
 0xbcb   : > { %v2647_v35 = vpop.eup %2646 }
 0xbcc   : > { %v1693_v36 = vsel %vm322_vm2, %v2647_v35, 0.0 }
 0xbcd   : > { %1694 = vadd.xlane.f32.xlu0 %v1693_v36  ;;  %v2265_v36 = vld [vmem:[%s3229_s3 + $0x60] sm:$0xff] }
 0xbcf   : > { %v2649_v37 = vpop.eup %2648 }
 0xbd0   : > { %v1854_v38 = vsel %vm322_vm2, %v2649_v37, 0.0 }
 0xbd1   : > { %1855 = vadd.xlane.f32.xlu1 %v1854_v38 }
 0xbe4   : > { %v1374_v39 = vpop.xlane.xlu0 %1373 }
 0xbe5   : > { %2650 = vrcp.f32 %v1374_v39  ;;  %v2267_v39 = vld [vmem:[%s3229_s3 + $0x70] sm:$0xff] }
 0xbef   : > { %v2651_v41 = vpop.eup %2650 }
 0xbf0   : > { %v1376_v42 = vmul.f32 %v2651_v41, %v2643_v23  ;;  %v2268_v41 = vld [vmem:[%s3229_s3 + $0x78] sm:$0xff] }
 0xbf2   : > { %2460 = vmatmul.mubr.msk.f32.vlgmr.msra.gmra.mrb[10].mxu1 %vm322_vm2, %v1376_v42  ;;  %v2568_v42 = vpack.c.bf16 %v2268_v41, %v2267_v39 }
 0xbf3   : > { %2468 = vmatpush3.msra.mxu1 %v3050_v11  ;;  %2469 = vmatprep.mubr.msk.f32.mxu1 %vm2731_vm0, %v2732_v6 }
 0xbf4   : > { %2477 = vmatprep.subr.mxu1 %v2732_v6 }
 0xc56   : > { %v1534_v43 = vpop.xlane.xlu1 %1533 }
 0xc57   : > { %2652 = vrcp.f32 %v1534_v43  ;;  %v1975_v43 = vrot.slane %v3036_v49, %v1009_v2 }
 0xc5a   : > { %v1695_v44 = vpop.xlane.xlu0 %1694 }
 0xc5b   : > { %2654 = vrcp.f32 %v1695_v44 }
 0xc5e   : > { %v1856_v45 = vpop.xlane.xlu1 %1855 }
 0xc5f   : > { %2656 = vrcp.f32 %v1856_v45 }
 0xc61   : > { %v2653_v50 = vpop.eup %2652 }
 0xc62   : > { %v1536_v51 = vmul.f32 %v2653_v50, %v2645_v33  ;;  %v2262_v33 = vld [vmem:[%s3229_s3 + $0x48] sm:$0xff] }
 0xc63   : > { %v2559_v34 = vpack.c.bf16 %v2262_v33, %v2261_v32 }
 0xc64   : > { %2470 = vmatmul.mubr.msk.f32.vlgmr.msra.gmra.mrb[12].mxu1 %vm322_vm2, %v1536_v51 }
 0xc65   : > { %v2655_v12 = vpop.eup %2654  ;;  %2478 = vmatpush3.msra.mxu1 %v3055_v53  ;;  %2479 = vmatprep.mubr.msk.f32.mxu1 %vm2731_vm0, %v2732_v6 }
 0xc66   : > { %v1697_v52 = vmul.f32 %v2655_v12, %v2647_v35  ;;  %2487 = vmatprep.subr.mxu1 %v2732_v6  ;;  %v2562_v35 = vpack.c.bf16 %v2264_v47, %v2263_v46 }
 0xc68   : > { %2480 = vmatmul.mubr.msk.f32.vlgmr.msra.gmra.mrb[14].mxu1 %vm322_vm2, %v1697_v52 }
 0xc69   : > { %v2657_v11 = vpop.eup %2656  ;;  %2488 = vmatpush3.msra.mxu1 %v3064_v54  ;;  %2489 = vmatprep.mubr.msk.f32.mxu1 %vm2731_vm0, %v2732_v6 }
 0xc6a   : > { %v1858_v55 = vmul.f32 %v2657_v11, %v2649_v37  ;;  %2558 = vmatprep.subr.bf16.mxu1 %v2730_v3  ;;  %v2266_v37 = vld [vmem:[%s3229_s3 + $0x68] sm:$0xff] }
 0xc6b   : > { %v2565_v38 = vpack.c.bf16 %v2266_v37, %v2265_v36 }
 0xc6c   : > { %2490 = vmatmul.mubr.msk.f32.vlgmr.msra.gmra.mrb[16].mxu1 %vm322_vm2, %v1858_v55  ;;  %v2059_v55 = vrot.slane %v3036_v49, %v1093_v18  ;;  %v2150_v18 = vrot.slane %v3036_v49, %v1185_v40 }
 0xc6d   : > { %2519 = vmatprep.mubr.msk.f32.mxu1 %vm2731_vm0, %v2732_v6  ;;  %2560 = vmatpush3.bf16.msra.mxu1 %v2559_v34 }
 0xc6e   : > { %2561 = vmatprep.subr.bf16.mxu1 %v2730_v3 }
 0xc71   : > { %2563 = vmatpush3.bf16.msra.mxu1 %v2562_v35 }
 0xc72   : > { %2564 = vmatprep.subr.bf16.mxu1 %v2730_v3 }
 0xc75   : > { %2566 = vmatpush3.bf16.msra.mxu1 %v2565_v38 }
 0xc76   : > { %2567 = vmatprep.subr.bf16.mxu1 %v2730_v3 }
 0xc79   : > { %2569 = vmatpush3.bf16.msra.mxu1 %v2568_v42 }
 0xcc5   : > { %v1446_v53 = vpop.f32.mrb[10].mxu1 }
 0xcc6   : > { %v2461_v56 = vpop.f32.mrb[11].mxu1 }
 0xd37   : > { %v1607_v57 = vpop.f32.mrb[12].mxu1 }
 0xd38   : > { %1934 = vrot.lane.b32.xlu0 %v1607_v57, %s2736_s7  ;;  %v2471_v58 = vpop.f32.mrb[13].mxu1  ;;  %s2672_s7 = scalar_lea.vmem %s2671_s6, 256 }
 0xd39   : > { %p2674_p1 = scmp.lt.s32.totalorder %s2672_s7, %s2666_s30 }
 0xd3b   : > { %v1768_v59 = vpop.f32.mrb[14].mxu1  ;;  %p2675_p2 = por %p2674_p1, %p2673_p0 }
 0xd3c   : > { %1938 = vrot.lane.b32.xlu1 %v1768_v59, %s2737_s8  ;;  %v2481_v54 = vpop.f32.mrb[15].mxu1 }
 0xd3d   : > { %p2676_p3 = pnand %p2675_p2, %p2669_p13 }
 0xd3f   : > { %v1929_v60 = vpop.f32.mrb[16].mxu1 }
 0xd40   : > { %1942 = vrot.lane.b32.xlu1 %v1929_v60, %s2738_s9  ;;  %v2491_v61 = vpop.f32.mrb[17].mxu1 }
 0xdaa   : > { %v1935_v62 = vpop.permute.xlu0 %1934 }
 0xdab   : > { %v1945_v0 = vsel %vm322_vm2, %v1446_v53, %v1935_v62 }
 0xdae   : > { %v1939_v63 = vpop.permute.xlu1 %1938 }
 0xdaf   : > { %v1946_v6 = vsel %vm978_vm4, %v1945_v0, %v1939_v63 }
 0xdb2   : > { %v1943_v1 = vpop.permute.xlu1 %1942 }
 0xdb3   : > { %v1947_v4 = vsel %vm980_vm5, %v1946_v6, %v1943_v1 }
 0xdb4   : > { %v1948_v5 = vadd.f32 %v1947_v4, %v3027_v48  ;;  %v2259_v48 = vld [vmem:[%s3228_s2 + $0x30] sm:$0xff] }
 0xdb5   : > { %v2556_v23 = vpack.c.bf16 %v2260_v19, %v2259_v48 }
 0xdb6   : > { %v1949_v7 = vsel %vm248_vm1, %v1948_v5, 0.0 }
 0xdb7   : > { %1950 = vadd.xlane.f32.xlu0 %v1949_v7  ;;  %2557 = vmatpush3.bf16.msra.mxu0 %v2556_v23 }
 0xe44   : > { %v1951_v9 = vpop.xlane.xlu0 %1950 }
 0xe45   : > { %v1952_v13 = vmul.f32 0.03125, %v1951_v9 }
 0xe47   : > { %v1953_v14 = vsub.f32 %v1948_v5, %v1952_v13  ;;  %v2155_v5 = vrot.slane %v3036_v49, %v1190_v8 }
 0xe49   : > { %v1954_v15 = vmul.f32 %v1953_v14, %v1953_v14 }
 0xe4b   : > { %v1955_v16 = vsel %vm248_vm1, %v1954_v15, 0.0 }
 0xe4c   : > { %1956 = vadd.xlane.f32.xlu1 %v1955_v16 }
 0xed9   : > { %v1957_v24 = vpop.xlane.xlu1 %1956 }
 0xeda   : > { %v1958_v25 = vmul.f32 0.03125, %v1957_v24 }
 0xedc   : > { %v1959_v26 = vadd.f32 1e-05, %v1958_v25 }
 0xede   : > { %2658 = vrsqrt.f32 %v1959_v26 }
 0xee8   : > { %v2659_v28 = vpop.eup %2658 }
 0xee9   : > { %v1961_v29 = vmul.f32 %v2659_v28, %v1953_v14 }
 0xeeb   : > { %v1966_v31 = vmul.f32 %v1965_v27, %v1961_v29 }
 0xeed   : > { %v1971_v22 = vadd.f32 %v1970_v30, %v1966_v31 }
 0xeef   : > { %2501 = vmatmul.mubr.msk.f32.vlgmr.msra.gmra.mrb[22].mxu0 %vm248_vm1, %v1971_v22 }
 0xfc2   : > { %v2045_v44 = vpop.f32.mrb[22].mxu0 }
 0xfc3   : > { %v2046_v45 = vadd.f32 %v2045_v44, %v1975_v43  ;;  %v2502_v50 = vpop.f32.mrb[23].mxu0 }
 0xfc5   : > { %v2284_v51 = vmul.f32 -1.442695, %v2046_v45 }
 0xfc7   : > { %2660 = vpow2.f32 %v2284_v51 }
 0xfd1   : > { %v2661_v3 = vpop.eup %2660 }
 0xfd2   : > { %v2052_v12 = vadd.f32 1.0, %v2661_v3 }
 0xfd4   : > { %2662 = vrcp.f32 %v2052_v12 }
 0xfde   : > { %v2663_v52 = vpop.eup %2662 }
 0xfdf   : > { %v2055_v11 = vmul.f32 %v2663_v52, %v2046_v45 }
 0xfe1   : > { %2520 = vmatmul.mubr.msk.f32.vlgmr.msra.gmra.mrb[18].mxu1 %vm1095_vm6, %v2055_v11 }
0x10b4   : > { %v2129_v53 = vpop.f32.mrb[18].mxu1 }
0x10b5   : > { %v2130_v56 = vadd.f32 %v2129_v53, %v2059_v55  ;;  %v2521_v2 = vpop.f32.mrb[19].mxu1 }
0x10b7   : > { %v2133_v57 = vadd.f32 %v2130_v56, %v1971_v22 }
0x10b9   : > { %v2134_v58 = vsel %vm248_vm1, %v2133_v57, 0.0 }
0x10ba   : > { %2135 = vadd.xlane.f32.xlu0 %v2134_v58 }
0x1147   : > { %v2136_v59 = vpop.xlane.xlu0 %2135 }
0x1148   : > { %v2137_v54 = vmul.f32 0.03125, %v2136_v59 }
0x114a   : > { %v2138_v60 = vsub.f32 %v2133_v57, %v2137_v54 }
0x114c   : > { %v2139_v61 = vmul.f32 %v2138_v60, %v2138_v60 }
0x114e   : > { %v2140_v62 = vsel %vm248_vm1, %v2139_v61, 0.0 }
0x114f   : > { %2141 = vadd.xlane.f32.xlu0 %v2140_v62 }
0x11dc   : > { %v2142_v63 = vpop.xlane.xlu0 %2141 }
0x11dd   : > { %v2143_v0 = vmul.f32 0.03125, %v2142_v63 }
0x11df   : > { %v2144_v6 = vadd.f32 1e-05, %v2143_v0 }
0x11e1   : > { %2664 = vrsqrt.f32 %v2144_v6 }
0x11eb   : > { %v2665_v1 = vpop.eup %2664 }
0x11ec   : > { %v2146_v4 = vmul.f32 %v2665_v1, %v2138_v60 }
0x11ee   : > { %v2151_v7 = vmul.f32 %v2150_v18, %v2146_v4 }
0x11f0   : > { %v2156_v9 = vadd.f32 %v2155_v5, %v2151_v7 }
0x11f2   : > { %2157 = vst.msk [vmem:[%s215_s25] sm:$0xff] %vm248_vm1, %v2156_v9 }
0x11f3   : > { %2679 = shalt.err (!%p2676_p3)
}
0x11f4   : > { %s2680_s8 = scalar_lea.hbm %s3183_s13, 128  ;;  %s2684_s15 = scalar_lea.hbm %s3231_s5, 256 }
0x11f5   : > { %p2681_p4 = scmp.ne.s32.totalorder %s3183_s13, %s2680_s8  ;;  %p2685_p9 = scmp.lt.u32.totalorder %s3183_s13, %s3231_s5 }
0x11f6   : > { %p2686_p10 = scmp.lt.u32.totalorder %s2684_s15, %s2680_s8  ;;  %p2688_p12 = scmp.lt.u32.totalorder %s2680_s8, %s3183_s13 }
0x11f7   : > { %p2682_p7 = pnand %p2681_p4, %p2808_p5 }
0x11f8   : > { %p2687_p11 = por %p2686_p10, %p2685_p9 }
0x11f9   : > { %p2683_p8 = pneg %p2682_p7 }
0x11fa   : > { %p2689_p13 = por %p2688_p12, %p2687_p11 }
0x11fc   : > { %p2690_p0 = pnand %p2689_p13, %p2683_p8 }
0x11fe   : > { %2693 = shalt.err (!%p2690_p0)
}
0x11ff   : > { %2570 = dma.vmem_to_hbm [thread:$0]  (%p2808_p5), %s3185_s10, 128, %s3183_s13, %s2159_s26  }
0x1200 PF: > { %p2576_p1 = scmp.ge.s32.totalorder %s2728_s21, 2  ;;  %s2184_s23 = sand.u32 1, %s2716_s18  }
0x1201   : > { %s2185_s25 = scalar_lea.sflag [#allocation3], %s2184_s23 }
0x1202   : > { %p2573_p2 = pnand %p2576_p1, %p2812_p6 }
0x1204   : > { %2711 = dma.done.wait (!%p2573_p2), %s2185_s25, 128  }
0x1205   : > { %2713 = vsyncadd (!%p2573_p2), %s2185_s25, 4294967168  ;;  %p15_p3 = scmp.ge.s32.totalorder %s2795_s24, 4   ;;  %s3234_s18 = smov %s2720_s19 }
0x1206   : > { %s3235_s19 = smov %s2724_s20  ;;  %s3236_s20 = smov %s2806_s27 }
0x1207   : > { %s3237_s21 = smov %s2795_s24  ;;  %17 = sbr.rel (!%p15_p3) target bundleno = 3 (0x3), region = 79 }
0x120e   :  { %2190 = vsyncpa [#allocation3], 1 }
0x120f   :  { %2192 = vsyncpa [#allocation3 + $0x1], 1 }

</bundles_post_ra>
